<compile_context>
chip_gen: v7x
topology: tpu7x:2x2x1
jax: 0.10.0
libtpu: 0.0.40
codegen_flags: <defaults>
</compile_context>

<pallas_src>
import functools

import jax
import jax.numpy as jnp
from jax.experimental import pallas as pl
from jax.experimental.pallas import tpu as pltpu

EPS = 1e-6        # TODO(synk): reference LayerNorm eps unknown; using 1e-6 (Annotated-Transformer style)
NEG_INF = -1e9

_LAYER_PARAM_ORDER = [
    "g1", "b1", "wq1", "bq1", "wk1", "bk1", "wv1", "bv1", "wo1", "bo1",
    "g2", "b2", "wq2", "bq2", "wk2", "bk2", "wv2", "bv2", "wo2", "bo2",
    "g3", "b3", "wf1", "bf1", "wf2", "bf2",
]


# ---------------------------------------------------------------------------
# In-kernel helpers (traced inside the Pallas kernel body)
# ---------------------------------------------------------------------------
def _layer_norm(x, gamma, beta):
    # x: (..., d) f32; gamma/beta: (1, d) f32 (broadcast).  Keep f32 on the VPU path.
    mean = jnp.mean(x, axis=-1, keepdims=True)
    var = jnp.mean((x - mean) ** 2, axis=-1, keepdims=True)
    return gamma * (x - mean) * jax.lax.rsqrt(var + EPS) + beta


def _mha(x_q, x_kv, valid, wq, bq, wk, bk, wv, bv, wo, bo,
         *, num_heads, d_attn, d_mid):
    """Batched multi-head attention for one decoder sub-block.

    x_q:  (B, Sq, Dq) f32      x_kv: (B, Sk, Dk) f32
    valid:(B, Sq, Sk) bool     weights: bf16, biases: f32
    1/sqrt(d_attn) is pre-folded into wq / bq at parameter-prep time.
    """
    B, Sq, Dq = x_q.shape
    _, Sk, Dk = x_kv.shape

    qf = x_q.reshape(B * Sq, Dq).astype(jnp.bfloat16)
    kvf = x_kv.reshape(B * Sk, Dk).astype(jnp.bfloat16)

    # Single big MXU matmuls across the whole (batch * sequence) dimension.
    q = jnp.dot(qf, wq, preferred_element_type=jnp.float32) + bq      # (B*Sq, H*da)
    k = jnp.dot(kvf, wk, preferred_element_type=jnp.float32) + bk     # (B*Sk, H*da)
    v = jnp.dot(kvf, wv, preferred_element_type=jnp.float32) + bv     # (B*Sk, H*dm)

    q3 = q.reshape(B, Sq, num_heads * d_attn).astype(jnp.bfloat16)
    k3 = k.reshape(B, Sk, num_heads * d_attn).astype(jnp.bfloat16)
    v3 = v.reshape(B, Sk, num_heads * d_mid).astype(jnp.bfloat16)

    outs = []
    # TODO(synk): heads stay as a static unrolled loop (Mosaic dot_general supports a single
    # batch dim); the batch dim B now feeds each MXU push instead of per-(b,h) 8x8 matmuls.
    for h in range(num_heads):
        qh = q3[:, :, h * d_attn:(h + 1) * d_attn]        # (B, Sq, da) bf16
        kh = k3[:, :, h * d_attn:(h + 1) * d_attn]        # (B, Sk, da) bf16
        vh = v3[:, :, h * d_mid:(h + 1) * d_mid]          # (B, Sk, dm) bf16

        s = jnp.einsum('bqd,bkd->bqk', qh, kh,
                       preferred_element_type=jnp.float32)            # (B, Sq, Sk) f32
        s = jnp.where(valid, s, NEG_INF)
        s = s - jnp.max(s, axis=-1, keepdims=True)
        p = jnp.exp(s)
        p = p * pl.reciprocal(jnp.sum(p, axis=-1, keepdims=True), approx=True)
        outs.append(jnp.einsum('bqk,bkd->bqd', p.astype(jnp.bfloat16), vh,
                               preferred_element_type=jnp.float32))   # (B, Sq, dm) f32

    concat = jnp.concatenate(outs, axis=-1)                           # (B, Sq, H*dm)
    cf = concat.reshape(B * Sq, num_heads * d_mid).astype(jnp.bfloat16)
    y = jnp.dot(cf, wo, preferred_element_type=jnp.float32) + bo      # (B*Sq, d_out)
    return y.reshape(B, Sq, -1)


# ---------------------------------------------------------------------------
# Fused decoder-stack kernel: grid = (num_layers,), all batch elements per step
# ---------------------------------------------------------------------------
def decoder_stack_kernel(*refs, num_heads, d_attn, d_mid):
    n_w = len(_LAYER_PARAM_ORDER)
    x_ref, z_ref, src_len_ref, tgt_len_ref = refs[0:4]
    wrefs = refs[4:4 + n_w]
    gF_ref = refs[4 + n_w]
    bF_ref = refs[5 + n_w]
    o_ref = refs[6 + n_w]
    x_acc = refs[7 + n_w]     # VMEM scratch: carries activations across layer iterations

    p = {name: r for name, r in zip(_LAYER_PARAM_ORDER, wrefs)}

    l = pl.program_id(0)

    @pl.when(l == 0)
    def _():
        x_acc[...] = x_ref[...]

    x = x_acc[...]                           # (B, Sx, Dx) f32
    z = z_ref[...]                           # (B, Sz, Dz) f32
    B, Sx, Dx = x.shape
    _, Sz, _ = z.shape

    # ---- masks built in-kernel (VPU work; no HBM mask traffic) ----
    k_t = jax.lax.broadcasted_iota(jnp.int32, (Sx, Sx), 1)       # key position
    q_t = jax.lax.broadcasted_iota(jnp.int32, (Sx, Sx), 0)       # query position
    tgt_len = tgt_len_ref[...]                                   # (B, 1, 1) int32
    src_len = src_len_ref[...]                                   # (B, 1, 1) int32
    tgt_valid = (k_t <= q_t)[None] & (k_t[None] < tgt_len)       # (B, Sx, Sx) MASKED strategy
    k_s = jax.lax.broadcasted_iota(jnp.int32, (Sx, Sz), 1)
    src_valid = k_s[None] < src_len                              # (B, Sx, Sz) UNMASKED strategy

    # ---- DecoderLayer ----
    # x = LN1(x); x = x + self_attn(x, x, tgt_mask)
    x = _layer_norm(x, p["g1"][0], p["b1"][0])
    x = x + _mha(x, x, tgt_valid,
                 p["wq1"][0], p["bq1"][0], p["wk1"][0], p["bk1"][0],
                 p["wv1"][0], p["bv1"][0], p["wo1"][0], p["bo1"][0],
                 num_heads=num_heads, d_attn=d_attn, d_mid=d_mid)

    # x = LN2(x); x = x + global_attn(z, x, src_mask)   (queries from x, keys/values from z)
    x = _layer_norm(x, p["g2"][0], p["b2"][0])
    x = x + _mha(x, z, src_valid,
                 p["wq2"][0], p["bq2"][0], p["wk2"][0], p["bk2"][0],
                 p["wv2"][0], p["bv2"][0], p["wo2"][0], p["bo2"][0],
                 num_heads=num_heads, d_attn=d_attn, d_mid=d_mid)

    # x = LN3(x); x = x + feed_forward(x)
    x = _layer_norm(x, p["g3"][0], p["b3"][0])
    xf = x.reshape(B * Sx, Dx).astype(jnp.bfloat16)
    hid = jnp.maximum(
        jnp.dot(xf, p["wf1"][0], preferred_element_type=jnp.float32) + p["bf1"][0], 0.0)
    y = jnp.dot(hid.astype(jnp.bfloat16), p["wf2"][0],
                preferred_element_type=jnp.float32) + p["bf2"][0]
    x = x + y.reshape(B, Sx, Dx)

    x_acc[...] = x

    # Final LayerNorm fused into the last layer iteration.
    @pl.when(l == pl.num_programs(0) - 1)
    def _():
        o_ref[...] = _layer_norm(x, gF_ref[...], bF_ref[...])


# ---------------------------------------------------------------------------
# Wrapper: stacks per-layer params, casts matmul weights to bf16, one pallas_call
# ---------------------------------------------------------------------------
def decoder_forward(z, x, src_len, tgt_len, all_params, final_g, final_b,
                    *, num_heads, d_attn, d_mid):
    B, Sx, d_x = x.shape
    Bz, Sz, d_z = z.shape
    assert Bz == B
    # The reference module applies the (d_z-input) K/V projections of the self-attention
    # block to x, so d_x == d_z is an inherent requirement of the module; d_out == d_x is
    # required for the residual adds.
    assert d_x == d_z
    num_layers = len(all_params)
    inv_scale = 1.0 / (float(d_attn) ** 0.5)

    def prep(name, arr):
        if name in ("wq1", "wq2", "bq1", "bq2"):   # fold 1/sqrt(d_attn) into the Q projection
            arr = arr * inv_scale
        if name.startswith("w"):                   # weight matrices live as bf16 (half the DMA)
            return arr.astype(jnp.bfloat16)
        return arr.astype(jnp.float32)             # biases / LayerNorm params stay f32

    stacked = [jnp.stack([prep(name, lp[name]) for lp in all_params], axis=0)
               for name in _LAYER_PARAM_ORDER]

    def full_spec(a):          # whole array resident, DMA'd once (constant block index)
        return pl.BlockSpec(a.shape, lambda l, n=a.ndim: (0,) * n)

    def layer_spec(a):         # one layer-slice per grid step (next layer prefetched)
        return pl.BlockSpec((1,) + a.shape[1:],
                            lambda l, n=a.ndim: (l,) + (0,) * (n - 1))

    in_specs = ([full_spec(x), full_spec(z), full_spec(src_len), full_spec(tgt_len)]
                + [layer_spec(a) for a in stacked]
                + [full_spec(final_g), full_spec(final_b)])

    kernel = functools.partial(decoder_stack_kernel,
                               num_heads=num_heads, d_attn=d_attn, d_mid=d_mid)

    return pl.pallas_call(
        kernel,
        out_shape=jax.ShapeDtypeStruct((B, Sx, d_x), jnp.float32),
        grid_spec=pltpu.PrefetchScalarGridSpec(
            num_scalar_prefetch=0,
            grid=(num_layers,),
            in_specs=in_specs,
            out_specs=pl.BlockSpec((B, Sx, d_x), lambda l: (0, 0, 0)),
            scratch_shapes=[pltpu.VMEM((B, Sx, d_x), jnp.float32)],
        ),
        # Layers carry state sequentially through the VMEM scratch -> "arbitrary".
        compiler_params=pltpu.CompilerParams(dimension_semantics=("arbitrary",)),
    )(x, z, src_len, tgt_len, *stacked, final_g, final_b)


# ---------------------------------------------------------------------------
# Deterministic parameter init (synthetic weights; shapes from __init__)
# ---------------------------------------------------------------------------
def init_decoder_params(key, num_layers, num_heads, d_attn, d_x, d_z, d_out, d_mid, d_mlp):
    def nrm(k, shape, scale=0.05):
        return (scale * jax.random.normal(k, shape)).astype(jnp.float32)

    all_params = []
    for _ in range(num_layers):
        keys = jax.random.split(key, 15)
        key = keys[0]
        p = {
            "g1": jnp.ones((1, d_x), jnp.float32), "b1": jnp.zeros((1, d_x), jnp.float32),
            "g2": jnp.ones((1, d_x), jnp.float32), "b2": jnp.zeros((1, d_x), jnp.float32),
            "g3": jnp.ones((1, d_x), jnp.float32), "b3": jnp.zeros((1, d_x), jnp.float32),
            # masked self-attention
            "wq1": nrm(keys[1], (d_x, num_heads * d_attn)), "bq1": jnp.zeros((1, num_heads * d_attn), jnp.float32),
            "wk1": nrm(keys[2], (d_z, num_heads * d_attn)), "bk1": jnp.zeros((1, num_heads * d_attn), jnp.float32),
            "wv1": nrm(keys[3], (d_z, num_heads * d_mid)),  "bv1": jnp.zeros((1, num_heads * d_mid), jnp.float32),
            "wo1": nrm(keys[4], (num_heads * d_mid, d_out)), "bo1": jnp.zeros((1, d_out), jnp.float32),
            # unmasked global (cross) attention
            "wq2": nrm(keys[5], (d_x, num_heads * d_attn)), "bq2": jnp.zeros((1, num_heads * d_attn), jnp.float32),
            "wk2": nrm(keys[6], (d_z, num_heads * d_attn)), "bk2": jnp.zeros((1, num_heads * d_attn), jnp.float32),
            "wv2": nrm(keys[7], (d_z, num_heads * d_mid)),  "bv2": jnp.zeros((1, num_heads * d_mid), jnp.float32),
            "wo2": nrm(keys[8], (num_heads * d_mid, d_out)), "bo2": jnp.zeros((1, d_out), jnp.float32),
            # feed-forward
            "wf1": nrm(keys[9], (d_x, d_mlp)),  "bf1": jnp.zeros((1, d_mlp), jnp.float32),
            "wf2": nrm(keys[10], (d_mlp, d_x)), "bf2": jnp.zeros((1, d_x), jnp.float32),
        }
        all_params.append(p)
    final_g = jnp.ones((1, d_x), jnp.float32)
    final_b = jnp.zeros((1, d_x), jnp.float32)
    return all_params, final_g, final_b


# ---------------------------------------------------------------------------
if __name__ == "__main__":
    # Small shapes consistent with the module
    num_layers, num_heads = 2, 2
    d_attn, d_x, d_z, d_out, d_mid, d_mlp = 8, 32, 32, 32, 8, 64
    B, Sx, Sz = 2, 8, 8

    key = jax.random.PRNGKey(0)
    k_z, k_x, k_p = jax.random.split(key, 3)

    z = jax.random.normal(k_z, (B, Sz, d_z), dtype=jnp.float32)
    x = jax.random.normal(k_x, (B, Sx, d_x), dtype=jnp.float32)

    # Padding expressed as per-batch valid lengths; the boolean src/tgt masks of the original
    # module (padding + causal for MASKED self-attention) are rebuilt inside the kernel.
    # batch 0: fully valid; batch 1: last 2 source tokens and last target token are padding.
    src_len = jnp.array([Sz, Sz - 2], dtype=jnp.int32).reshape(B, 1, 1)
    tgt_len = jnp.array([Sx, Sx - 1], dtype=jnp.int32).reshape(B, 1, 1)

    all_params, final_g, final_b = init_decoder_params(
        k_p, num_layers, num_heads, d_attn, d_x, d_z, d_out, d_mid, d_mlp)

    out = decoder_forward(z, x, src_len, tgt_len, all_params, final_g, final_b,
                          num_heads=num_heads, d_attn=d_attn, d_mid=d_mid)
    out = jax.block_until_ready(out)
    assert out.shape == (B, Sx, d_x) and bool(jnp.all(jnp.isfinite(out)))
    print("KERNEL_OK")
</pallas_src>

<mosaic_0001>
module attributes {stable_mosaic.version = 11 : i64} {
  func.func @decoder_stack_kernel(%arg0: i32, %arg1: memref<2x8x32xf32, #tpu.memory_space<vmem>>, %arg2: memref<2x8x32xf32, #tpu.memory_space<vmem>>, %arg3: memref<2x1x1xi32, #tpu.memory_space<vmem>>, %arg4: memref<2x1x1xi32, #tpu.memory_space<vmem>>, %arg5: memref<1x1x32xf32, #tpu.memory_space<vmem>>, %arg6: memref<1x1x32xf32, #tpu.memory_space<vmem>>, %arg7: memref<1x32x16xbf16, #tpu.memory_space<vmem>>, %arg8: memref<1x1x16xf32, #tpu.memory_space<vmem>>, %arg9: memref<1x32x16xbf16, #tpu.memory_space<vmem>>, %arg10: memref<1x1x16xf32, #tpu.memory_space<vmem>>, %arg11: memref<1x32x16xbf16, #tpu.memory_space<vmem>>, %arg12: memref<1x1x16xf32, #tpu.memory_space<vmem>>, %arg13: memref<1x16x32xbf16, #tpu.memory_space<vmem>>, %arg14: memref<1x1x32xf32, #tpu.memory_space<vmem>>, %arg15: memref<1x1x32xf32, #tpu.memory_space<vmem>>, %arg16: memref<1x1x32xf32, #tpu.memory_space<vmem>>, %arg17: memref<1x32x16xbf16, #tpu.memory_space<vmem>>, %arg18: memref<1x1x16xf32, #tpu.memory_space<vmem>>, %arg19: memref<1x32x16xbf16, #tpu.memory_space<vmem>>, %arg20: memref<1x1x16xf32, #tpu.memory_space<vmem>>, %arg21: memref<1x32x16xbf16, #tpu.memory_space<vmem>>, %arg22: memref<1x1x16xf32, #tpu.memory_space<vmem>>, %arg23: memref<1x16x32xbf16, #tpu.memory_space<vmem>>, %arg24: memref<1x1x32xf32, #tpu.memory_space<vmem>>, %arg25: memref<1x1x32xf32, #tpu.memory_space<vmem>>, %arg26: memref<1x1x32xf32, #tpu.memory_space<vmem>>, %arg27: memref<1x32x64xbf16, #tpu.memory_space<vmem>>, %arg28: memref<1x1x64xf32, #tpu.memory_space<vmem>>, %arg29: memref<1x64x32xbf16, #tpu.memory_space<vmem>>, %arg30: memref<1x1x32xf32, #tpu.memory_space<vmem>>, %arg31: memref<1x32xf32, #tpu.memory_space<vmem>>, %arg32: memref<1x32xf32, #tpu.memory_space<vmem>>, %arg33: memref<2x8x32xf32, #tpu.memory_space<vmem>>, %arg34: memref<2x8x32xf32, #tpu.memory_space<vmem>>) attributes {dimension_semantics = [#tpu.dimension_semantics<arbitrary>], iteration_bounds = array<i64: 2>, scalar_prefetch = 0 : i64, scratch_operands = 1 : i64, tpu.core_type = #tpu.core_type<tc>, window_params = [{pipeline_mode = #tpu.pipeline_mode<synchronous>, transform_indices = @transform_0, window_bounds = array<i64: 2, 8, 32>}, {pipeline_mode = #tpu.pipeline_mode<synchronous>, transform_indices = @transform_1, window_bounds = array<i64: 2, 8, 32>}, {pipeline_mode = #tpu.pipeline_mode<synchronous>, transform_indices = @transform_2, window_bounds = array<i64: 2, 1, 1>}, {pipeline_mode = #tpu.pipeline_mode<synchronous>, transform_indices = @transform_3, window_bounds = array<i64: 2, 1, 1>}, {transform_indices = @transform_4, window_bounds = array<i64: 1, 1, 32>}, {transform_indices = @transform_5, window_bounds = array<i64: 1, 1, 32>}, {transform_indices = @transform_6, window_bounds = array<i64: 1, 32, 16>}, {transform_indices = @transform_7, window_bounds = array<i64: 1, 1, 16>}, {transform_indices = @transform_8, window_bounds = array<i64: 1, 32, 16>}, {transform_indices = @transform_9, window_bounds = array<i64: 1, 1, 16>}, {transform_indices = @transform_10, window_bounds = array<i64: 1, 32, 16>}, {transform_indices = @transform_11, window_bounds = array<i64: 1, 1, 16>}, {transform_indices = @transform_12, window_bounds = array<i64: 1, 16, 32>}, {transform_indices = @transform_13, window_bounds = array<i64: 1, 1, 32>}, {transform_indices = @transform_14, window_bounds = array<i64: 1, 1, 32>}, {transform_indices = @transform_15, window_bounds = array<i64: 1, 1, 32>}, {transform_indices = @transform_16, window_bounds = array<i64: 1, 32, 16>}, {transform_indices = @transform_17, window_bounds = array<i64: 1, 1, 16>}, {transform_indices = @transform_18, window_bounds = array<i64: 1, 32, 16>}, {transform_indices = @transform_19, window_bounds = array<i64: 1, 1, 16>}, {transform_indices = @transform_20, window_bounds = array<i64: 1, 32, 16>}, {transform_indices = @transform_21, window_bounds = array<i64: 1, 1, 16>}, {transform_indices = @transform_22, window_bounds = array<i64: 1, 16, 32>}, {transform_indices = @transform_23, window_bounds = array<i64: 1, 1, 32>}, {transform_indices = @transform_24, window_bounds = array<i64: 1, 1, 32>}, {transform_indices = @transform_25, window_bounds = array<i64: 1, 1, 32>}, {transform_indices = @transform_26, window_bounds = array<i64: 1, 32, 64>}, {transform_indices = @transform_27, window_bounds = array<i64: 1, 1, 64>}, {transform_indices = @transform_28, window_bounds = array<i64: 1, 64, 32>}, {transform_indices = @transform_29, window_bounds = array<i64: 1, 1, 32>}, {pipeline_mode = #tpu.pipeline_mode<synchronous>, transform_indices = @transform_30, window_bounds = array<i64: 1, 32>}, {pipeline_mode = #tpu.pipeline_mode<synchronous>, transform_indices = @transform_31, window_bounds = array<i64: 1, 32>}, {pipeline_mode = #tpu.pipeline_mode<synchronous>, transform_indices = @transform_32, window_bounds = array<i64: 2, 8, 32>}]} {
    %c0_i32 = arith.constant 0 : i32
    %0 = arith.cmpi eq, %arg0, %c0_i32 : i32
    %1 = arith.extui %0 : i1 to i32
    %c0_i32_0 = arith.constant 0 : i32
    %2 = arith.cmpi ne, %1, %c0_i32_0 : i32
    scf.if %2 {
      %c0_139 = arith.constant 0 : index
      %c0_140 = arith.constant 0 : index
      %c0_141 = arith.constant 0 : index
      %289 = vector.load %arg1[%c0_139, %c0_140, %c0_141] : memref<2x8x32xf32, #tpu.memory_space<vmem>>, vector<2x8x32xf32>
      %c0_142 = arith.constant 0 : index
      %c0_143 = arith.constant 0 : index
      %c0_144 = arith.constant 0 : index
      %290 = vector.load %arg34[%c0_142, %c0_143, %c0_144] : memref<2x8x32xf32, #tpu.memory_space<vmem>>, vector<2x8x32xf32>
      tpu.vector_store %arg34[%c0_142, %c0_143, %c0_144], %289 {strides = array<i32>} : memref<2x8x32xf32, #tpu.memory_space<vmem>>, vector<2x8x32xf32>,
    } else {
    }
    %c0 = arith.constant 0 : index
    %c0_1 = arith.constant 0 : index
    %c0_2 = arith.constant 0 : index
    %3 = vector.load %arg34[%c0, %c0_1, %c0_2] : memref<2x8x32xf32, #tpu.memory_space<vmem>>, vector<2x8x32xf32>
    %c0_3 = arith.constant 0 : index
    %c0_4 = arith.constant 0 : index
    %c0_5 = arith.constant 0 : index
    %4 = vector.load %arg2[%c0_3, %c0_4, %c0_5] : memref<2x8x32xf32, #tpu.memory_space<vmem>>, vector<2x8x32xf32>
    %5 = tpu.iota {dimensions = array<i32: 1>} : vector<8x8xi32>
    %6 = tpu.iota {dimensions = array<i32: 0>} : vector<8x8xi32>
    %c0_6 = arith.constant 0 : index
    %c0_7 = arith.constant 0 : index
    %c0_8 = arith.constant 0 : index
    %7 = vector.load %arg4[%c0_6, %c0_7, %c0_8] : memref<2x1x1xi32, #tpu.memory_space<vmem>>, vector<2x1x1xi32>
    %c0_9 = arith.constant 0 : index
    %c0_10 = arith.constant 0 : index
    %c0_11 = arith.constant 0 : index
    %8 = vector.load %arg3[%c0_9, %c0_10, %c0_11] : memref<2x1x1xi32, #tpu.memory_space<vmem>>, vector<2x1x1xi32>
    %9 = arith.cmpi sle, %5, %6 : vector<8x8xi32>
    %10 = vector.shape_cast %9 : vector<8x8xi1> to vector<1x8x8xi1>
    %11 = vector.shape_cast %5 : vector<8x8xi32> to vector<1x8x8xi32>
    %12 = vector.broadcast %11 : vector<1x8x8xi32> to vector<2x8x8xi32>
    %13 = vector.broadcast %7 : vector<2x1x1xi32> to vector<2x8x8xi32>
    %14 = arith.cmpi slt, %12, %13 : vector<2x8x8xi32>
    %15 = vector.broadcast %10 : vector<1x8x8xi1> to vector<2x8x8xi1>
    %16 = arith.andi %15, %14 : vector<2x8x8xi1>
    %17 = tpu.iota {dimensions = array<i32: 1>} : vector<8x8xi32>
    %18 = vector.shape_cast %17 : vector<8x8xi32> to vector<1x8x8xi32>
    %19 = vector.broadcast %18 : vector<1x8x8xi32> to vector<2x8x8xi32>
    %20 = vector.broadcast %8 : vector<2x1x1xi32> to vector<2x8x8xi32>
    %21 = arith.cmpi slt, %19, %20 : vector<2x8x8xi32>
    %c0_12 = arith.constant 0 : index
    %c0_13 = arith.constant 0 : index
    %c0_14 = arith.constant 0 : index
    %22 = vector.load %arg5[%c0_12, %c0_13, %c0_14] : memref<1x1x32xf32, #tpu.memory_space<vmem>>, vector<1x1x32xf32>
    %23 = vector.shape_cast %22 : vector<1x1x32xf32> to vector<1x32xf32>
    %c0_15 = arith.constant 0 : index
    %c0_16 = arith.constant 0 : index
    %c0_17 = arith.constant 0 : index
    %24 = vector.load %arg6[%c0_15, %c0_16, %c0_17] : memref<1x1x32xf32, #tpu.memory_space<vmem>>, vector<1x1x32xf32>
    %25 = vector.shape_cast %24 : vector<1x1x32xf32> to vector<1x32xf32>
    %cst = arith.constant dense<0.000000e+00> : vector<2x8xf32>
    %26 = vector.multi_reduction <add>, %3, %cst [2] : vector<2x8x32xf32> to vector<2x8xf32>
    %27 = vector.shape_cast %26 : vector<2x8xf32> to vector<2x8x1xf32>
    %cst_18 = arith.constant 3.200000e+01 : f32
    %28 = vector.broadcast %cst_18 : f32 to vector<2x8x1xf32>
    %29 = arith.divf %27, %28 : vector<2x8x1xf32>
    %30 = vector.broadcast %29 : vector<2x8x1xf32> to vector<2x8x32xf32>
    %31 = arith.subf %3, %30 : vector<2x8x32xf32>
    %32 = arith.mulf %31, %31 : vector<2x8x32xf32>
    %cst_19 = arith.constant dense<0.000000e+00> : vector<2x8xf32>
    %33 = vector.multi_reduction <add>, %32, %cst_19 [2] : vector<2x8x32xf32> to vector<2x8xf32>
    %34 = vector.shape_cast %33 : vector<2x8xf32> to vector<2x8x1xf32>
    %cst_20 = arith.constant 3.200000e+01 : f32
    %35 = vector.broadcast %cst_20 : f32 to vector<2x8x1xf32>
    %36 = arith.divf %34, %35 : vector<2x8x1xf32>
    %37 = vector.broadcast %29 : vector<2x8x1xf32> to vector<2x8x32xf32>
    %38 = arith.subf %3, %37 : vector<2x8x32xf32>
    %39 = vector.shape_cast %23 : vector<1x32xf32> to vector<1x1x32xf32>
    %40 = vector.broadcast %39 : vector<1x1x32xf32> to vector<2x8x32xf32>
    %41 = arith.mulf %40, %38 : vector<2x8x32xf32>
    %cst_21 = arith.constant 9.99999997E-7 : f32
    %42 = vector.broadcast %cst_21 : f32 to vector<2x8x1xf32>
    %43 = arith.addf %36, %42 : vector<2x8x1xf32>
    %44 = math.rsqrt %43 : vector<2x8x1xf32>
    %45 = vector.broadcast %44 : vector<2x8x1xf32> to vector<2x8x32xf32>
    %46 = arith.mulf %41, %45 : vector<2x8x32xf32>
    %47 = vector.shape_cast %25 : vector<1x32xf32> to vector<1x1x32xf32>
    %48 = vector.broadcast %47 : vector<1x1x32xf32> to vector<2x8x32xf32>
    %49 = arith.addf %46, %48 : vector<2x8x32xf32>
    %c0_22 = arith.constant 0 : index
    %c0_23 = arith.constant 0 : index
    %c0_24 = arith.constant 0 : index
    %50 = vector.load %arg7[%c0_22, %c0_23, %c0_24] : memref<1x32x16xbf16, #tpu.memory_space<vmem>>, vector<1x32x16xbf16>
    %51 = vector.shape_cast %50 : vector<1x32x16xbf16> to vector<32x16xbf16>
    %c0_25 = arith.constant 0 : index
    %c0_26 = arith.constant 0 : index
    %c0_27 = arith.constant 0 : index
    %52 = vector.load %arg8[%c0_25, %c0_26, %c0_27] : memref<1x1x16xf32, #tpu.memory_space<vmem>>, vector<1x1x16xf32>
    %53 = vector.shape_cast %52 : vector<1x1x16xf32> to vector<1x16xf32>
    %c0_28 = arith.constant 0 : index
    %c0_29 = arith.constant 0 : index
    %c0_30 = arith.constant 0 : index
    %54 = vector.load %arg9[%c0_28, %c0_29, %c0_30] : memref<1x32x16xbf16, #tpu.memory_space<vmem>>, vector<1x32x16xbf16>
    %55 = vector.shape_cast %54 : vector<1x32x16xbf16> to vector<32x16xbf16>
    %c0_31 = arith.constant 0 : index
    %c0_32 = arith.constant 0 : index
    %c0_33 = arith.constant 0 : index
    %56 = vector.load %arg10[%c0_31, %c0_32, %c0_33] : memref<1x1x16xf32, #tpu.memory_space<vmem>>, vector<1x1x16xf32>
    %57 = vector.shape_cast %56 : vector<1x1x16xf32> to vector<1x16xf32>
    %c0_34 = arith.constant 0 : index
    %c0_35 = arith.constant 0 : index
    %c0_36 = arith.constant 0 : index
    %58 = vector.load %arg11[%c0_34, %c0_35, %c0_36] : memref<1x32x16xbf16, #tpu.memory_space<vmem>>, vector<1x32x16xbf16>
    %59 = vector.shape_cast %58 : vector<1x32x16xbf16> to vector<32x16xbf16>
    %c0_37 = arith.constant 0 : index
    %c0_38 = arith.constant 0 : index
    %c0_39 = arith.constant 0 : index
    %60 = vector.load %arg12[%c0_37, %c0_38, %c0_39] : memref<1x1x16xf32, #tpu.memory_space<vmem>>, vector<1x1x16xf32>
    %61 = vector.shape_cast %60 : vector<1x1x16xf32> to vector<1x16xf32>
    %c0_40 = arith.constant 0 : index
    %c0_41 = arith.constant 0 : index
    %c0_42 = arith.constant 0 : index
    %62 = vector.load %arg13[%c0_40, %c0_41, %c0_42] : memref<1x16x32xbf16, #tpu.memory_space<vmem>>, vector<1x16x32xbf16>
    %63 = vector.shape_cast %62 : vector<1x16x32xbf16> to vector<16x32xbf16>
    %c0_43 = arith.constant 0 : index
    %c0_44 = arith.constant 0 : index
    %c0_45 = arith.constant 0 : index
    %64 = vector.load %arg14[%c0_43, %c0_44, %c0_45] : memref<1x1x32xf32, #tpu.memory_space<vmem>>, vector<1x1x32xf32>
    %65 = vector.shape_cast %64 : vector<1x1x32xf32> to vector<1x32xf32>
    %66 = vector.shape_cast %49 : vector<2x8x32xf32> to vector<16x32xf32>
    %67 = arith.truncf %66 : vector<16x32xf32> to vector<16x32xbf16>
    %68 = vector.shape_cast %49 : vector<2x8x32xf32> to vector<16x32xf32>
    %69 = arith.truncf %68 : vector<16x32xf32> to vector<16x32xbf16>
    %cst_46 = arith.constant dense<0.000000e+00> : vector<16x16xf32>
    %70 = tpu.matmul %67, %51, %cst_46 {dimension_numbers = #tpu.dot_dimension_numbers<[1], [0], [0], [1], [0, 0, 1, 1], [], []>} : vector<16x32xbf16>, vector<32x16xbf16>, vector<16x16xf32> -> vector<16x16xf32>
    %71 = vector.broadcast %53 : vector<1x16xf32> to vector<16x16xf32>
    %72 = arith.addf %70, %71 : vector<16x16xf32>
    %cst_47 = arith.constant dense<0.000000e+00> : vector<16x16xf32>
    %73 = tpu.matmul %69, %55, %cst_47 {dimension_numbers = #tpu.dot_dimension_numbers<[1], [0], [0], [1], [0, 0, 1, 1], [], []>} : vector<16x32xbf16>, vector<32x16xbf16>, vector<16x16xf32> -> vector<16x16xf32>
    %74 = vector.broadcast %57 : vector<1x16xf32> to vector<16x16xf32>
    %75 = arith.addf %73, %74 : vector<16x16xf32>
    %cst_48 = arith.constant dense<0.000000e+00> : vector<16x16xf32>
    %76 = tpu.matmul %69, %59, %cst_48 {dimension_numbers = #tpu.dot_dimension_numbers<[1], [0], [0], [1], [0, 0, 1, 1], [], []>} : vector<16x32xbf16>, vector<32x16xbf16>, vector<16x16xf32> -> vector<16x16xf32>
    %77 = vector.broadcast %61 : vector<1x16xf32> to vector<16x16xf32>
    %78 = arith.addf %76, %77 : vector<16x16xf32>
    %79 = vector.shape_cast %72 : vector<16x16xf32> to vector<2x8x16xf32>
    %80 = arith.truncf %79 : vector<2x8x16xf32> to vector<2x8x16xbf16>
    %81 = vector.shape_cast %75 : vector<16x16xf32> to vector<2x8x16xf32>
    %82 = arith.truncf %81 : vector<2x8x16xf32> to vector<2x8x16xbf16>
    %83 = vector.shape_cast %78 : vector<16x16xf32> to vector<2x8x16xf32>
    %84 = arith.truncf %83 : vector<2x8x16xf32> to vector<2x8x16xbf16>
    %85 = vector.extract_strided_slice %80 {offsets = [0, 0, 0], sizes = [2, 8, 8], strides = [1, 1, 1]} : vector<2x8x16xbf16> to vector<2x8x8xbf16>
    %86 = vector.extract_strided_slice %82 {offsets = [0, 0, 0], sizes = [2, 8, 8], strides = [1, 1, 1]} : vector<2x8x16xbf16> to vector<2x8x8xbf16>
    %87 = vector.extract_strided_slice %84 {offsets = [0, 0, 0], sizes = [2, 8, 8], strides = [1, 1, 1]} : vector<2x8x16xbf16> to vector<2x8x8xbf16>
    "tpu.trace_start"() <{level = 10 : i32, message = "bqd,bkd->bqk"}> : () -> ()
    %cst_49 = arith.constant dense<0.000000e+00> : vector<2x8x8xf32>
    %88 = tpu.matmul %85, %86, %cst_49 {dimension_numbers = #tpu.dot_dimension_numbers<[2], [2], [1], [1], [0, 0, 0, 1, 1, 1], [0], [0]>} : vector<2x8x8xbf16>, vector<2x8x8xbf16>, vector<2x8x8xf32> -> vector<2x8x8xf32>
    %cst_50 = arith.constant -1.000000e+09 : f32
    "tpu.trace_stop"() : () -> ()
    %89 = vector.broadcast %cst_50 : f32 to vector<2x8x8xf32>
    %90 = arith.select %16, %88, %89 : vector<2x8x8xi1>, vector<2x8x8xf32>
    %cst_51 = arith.constant dense<0xFF800000> : vector<2x8xf32>
    %91 = vector.multi_reduction <maximumf>, %90, %cst_51 [2] : vector<2x8x8xf32> to vector<2x8xf32>
    %92 = vector.shape_cast %91 : vector<2x8xf32> to vector<2x8x1xf32>
    %93 = vector.broadcast %92 : vector<2x8x1xf32> to vector<2x8x8xf32>
    %94 = arith.subf %90, %93 : vector<2x8x8xf32>
    %95 = math.exp %94 : vector<2x8x8xf32>
    %cst_52 = arith.constant dense<0.000000e+00> : vector<2x8xf32>
    %96 = vector.multi_reduction <add>, %95, %cst_52 [2] : vector<2x8x8xf32> to vector<2x8xf32>
    %97 = vector.shape_cast %96 : vector<2x8xf32> to vector<2x8x1xf32>
    %98 = tpu.reciprocal %97 {approx = true} : vector<2x8x1xf32> -> vector<2x8x1xf32>
    %99 = vector.broadcast %98 : vector<2x8x1xf32> to vector<2x8x8xf32>
    %100 = arith.mulf %95, %99 : vector<2x8x8xf32>
    %101 = arith.truncf %100 : vector<2x8x8xf32> to vector<2x8x8xbf16>
    "tpu.trace_start"() <{level = 10 : i32, message = "bqk,bkd->bqd"}> : () -> ()
    %cst_53 = arith.constant dense<0.000000e+00> : vector<2x8x8xf32>
    %102 = tpu.matmul %101, %87, %cst_53 {dimension_numbers = #tpu.dot_dimension_numbers<[2], [1], [1], [2], [0, 0, 0, 1, 1, 2], [0], [0]>} : vector<2x8x8xbf16>, vector<2x8x8xbf16>, vector<2x8x8xf32> -> vector<2x8x8xf32>
    "tpu.trace_stop"() : () -> ()
    %103 = vector.extract_strided_slice %80 {offsets = [0, 0, 8], sizes = [2, 8, 8], strides = [1, 1, 1]} : vector<2x8x16xbf16> to vector<2x8x8xbf16>
    %104 = vector.extract_strided_slice %82 {offsets = [0, 0, 8], sizes = [2, 8, 8], strides = [1, 1, 1]} : vector<2x8x16xbf16> to vector<2x8x8xbf16>
    %105 = vector.extract_strided_slice %84 {offsets = [0, 0, 8], sizes = [2, 8, 8], strides = [1, 1, 1]} : vector<2x8x16xbf16> to vector<2x8x8xbf16>
    "tpu.trace_start"() <{level = 10 : i32, message = "bqd,bkd->bqk"}> : () -> ()
    %cst_54 = arith.constant dense<0.000000e+00> : vector<2x8x8xf32>
    %106 = tpu.matmul %103, %104, %cst_54 {dimension_numbers = #tpu.dot_dimension_numbers<[2], [2], [1], [1], [0, 0, 0, 1, 1, 1], [0], [0]>} : vector<2x8x8xbf16>, vector<2x8x8xbf16>, vector<2x8x8xf32> -> vector<2x8x8xf32>
    %cst_55 = arith.constant -1.000000e+09 : f32
    "tpu.trace_stop"() : () -> ()
    %107 = vector.broadcast %cst_55 : f32 to vector<2x8x8xf32>
    %108 = arith.select %16, %106, %107 : vector<2x8x8xi1>, vector<2x8x8xf32>
    %cst_56 = arith.constant dense<0xFF800000> : vector<2x8xf32>
    %109 = vector.multi_reduction <maximumf>, %108, %cst_56 [2] : vector<2x8x8xf32> to vector<2x8xf32>
    %110 = vector.shape_cast %109 : vector<2x8xf32> to vector<2x8x1xf32>
    %111 = vector.broadcast %110 : vector<2x8x1xf32> to vector<2x8x8xf32>
    %112 = arith.subf %108, %111 : vector<2x8x8xf32>
    %113 = math.exp %112 : vector<2x8x8xf32>
    %cst_57 = arith.constant dense<0.000000e+00> : vector<2x8xf32>
    %114 = vector.multi_reduction <add>, %113, %cst_57 [2] : vector<2x8x8xf32> to vector<2x8xf32>
    %115 = vector.shape_cast %114 : vector<2x8xf32> to vector<2x8x1xf32>
    %116 = tpu.reciprocal %115 {approx = true} : vector<2x8x1xf32> -> vector<2x8x1xf32>
    %117 = vector.broadcast %116 : vector<2x8x1xf32> to vector<2x8x8xf32>
    %118 = arith.mulf %113, %117 : vector<2x8x8xf32>
    %119 = arith.truncf %118 : vector<2x8x8xf32> to vector<2x8x8xbf16>
    "tpu.trace_start"() <{level = 10 : i32, message = "bqk,bkd->bqd"}> : () -> ()
    %cst_58 = arith.constant dense<0.000000e+00> : vector<2x8x8xf32>
    %120 = tpu.matmul %119, %105, %cst_58 {dimension_numbers = #tpu.dot_dimension_numbers<[2], [1], [1], [2], [0, 0, 0, 1, 1, 2], [0], [0]>} : vector<2x8x8xbf16>, vector<2x8x8xbf16>, vector<2x8x8xf32> -> vector<2x8x8xf32>
    "tpu.trace_stop"() : () -> ()
    %121 = tpu.concatenate %102, %120 in 2 : vector<2x8x8xf32>, vector<2x8x8xf32> -> vector<2x8x16xf32>
    %122 = vector.shape_cast %121 : vector<2x8x16xf32> to vector<16x16xf32>
    %123 = arith.truncf %122 : vector<16x16xf32> to vector<16x16xbf16>
    %cst_59 = arith.constant dense<0.000000e+00> : vector<16x32xf32>
    %124 = tpu.matmul %123, %63, %cst_59 {dimension_numbers = #tpu.dot_dimension_numbers<[1], [0], [0], [1], [0, 0, 1, 1], [], []>} : vector<16x16xbf16>, vector<16x32xbf16>, vector<16x32xf32> -> vector<16x32xf32>
    %125 = vector.broadcast %65 : vector<1x32xf32> to vector<16x32xf32>
    %126 = arith.addf %124, %125 : vector<16x32xf32>
    %127 = vector.shape_cast %126 : vector<16x32xf32> to vector<2x8x32xf32>
    %128 = arith.addf %49, %127 : vector<2x8x32xf32>
    %c0_60 = arith.constant 0 : index
    %c0_61 = arith.constant 0 : index
    %c0_62 = arith.constant 0 : index
    %129 = vector.load %arg15[%c0_60, %c0_61, %c0_62] : memref<1x1x32xf32, #tpu.memory_space<vmem>>, vector<1x1x32xf32>
    %130 = vector.shape_cast %129 : vector<1x1x32xf32> to vector<1x32xf32>
    %c0_63 = arith.constant 0 : index
    %c0_64 = arith.constant 0 : index
    %c0_65 = arith.constant 0 : index
    %131 = vector.load %arg16[%c0_63, %c0_64, %c0_65] : memref<1x1x32xf32, #tpu.memory_space<vmem>>, vector<1x1x32xf32>
    %132 = vector.shape_cast %131 : vector<1x1x32xf32> to vector<1x32xf32>
    %cst_66 = arith.constant dense<0.000000e+00> : vector<2x8xf32>
    %133 = vector.multi_reduction <add>, %128, %cst_66 [2] : vector<2x8x32xf32> to vector<2x8xf32>
    %134 = vector.shape_cast %133 : vector<2x8xf32> to vector<2x8x1xf32>
    %cst_67 = arith.constant 3.200000e+01 : f32
    %135 = vector.broadcast %cst_67 : f32 to vector<2x8x1xf32>
    %136 = arith.divf %134, %135 : vector<2x8x1xf32>
    %137 = vector.broadcast %136 : vector<2x8x1xf32> to vector<2x8x32xf32>
    %138 = arith.subf %128, %137 : vector<2x8x32xf32>
    %139 = arith.mulf %138, %138 : vector<2x8x32xf32>
    %cst_68 = arith.constant dense<0.000000e+00> : vector<2x8xf32>
    %140 = vector.multi_reduction <add>, %139, %cst_68 [2] : vector<2x8x32xf32> to vector<2x8xf32>
    %141 = vector.shape_cast %140 : vector<2x8xf32> to vector<2x8x1xf32>
    %cst_69 = arith.constant 3.200000e+01 : f32
    %142 = vector.broadcast %cst_69 : f32 to vector<2x8x1xf32>
    %143 = arith.divf %141, %142 : vector<2x8x1xf32>
    %144 = vector.broadcast %136 : vector<2x8x1xf32> to vector<2x8x32xf32>
    %145 = arith.subf %128, %144 : vector<2x8x32xf32>
    %146 = vector.shape_cast %130 : vector<1x32xf32> to vector<1x1x32xf32>
    %147 = vector.broadcast %146 : vector<1x1x32xf32> to vector<2x8x32xf32>
    %148 = arith.mulf %147, %145 : vector<2x8x32xf32>
    %cst_70 = arith.constant 9.99999997E-7 : f32
    %149 = vector.broadcast %cst_70 : f32 to vector<2x8x1xf32>
    %150 = arith.addf %143, %149 : vector<2x8x1xf32>
    %151 = math.rsqrt %150 : vector<2x8x1xf32>
    %152 = vector.broadcast %151 : vector<2x8x1xf32> to vector<2x8x32xf32>
    %153 = arith.mulf %148, %152 : vector<2x8x32xf32>
    %154 = vector.shape_cast %132 : vector<1x32xf32> to vector<1x1x32xf32>
    %155 = vector.broadcast %154 : vector<1x1x32xf32> to vector<2x8x32xf32>
    %156 = arith.addf %153, %155 : vector<2x8x32xf32>
    %c0_71 = arith.constant 0 : index
    %c0_72 = arith.constant 0 : index
    %c0_73 = arith.constant 0 : index
    %157 = vector.load %arg17[%c0_71, %c0_72, %c0_73] : memref<1x32x16xbf16, #tpu.memory_space<vmem>>, vector<1x32x16xbf16>
    %158 = vector.shape_cast %157 : vector<1x32x16xbf16> to vector<32x16xbf16>
    %c0_74 = arith.constant 0 : index
    %c0_75 = arith.constant 0 : index
    %c0_76 = arith.constant 0 : index
    %159 = vector.load %arg18[%c0_74, %c0_75, %c0_76] : memref<1x1x16xf32, #tpu.memory_space<vmem>>, vector<1x1x16xf32>
    %160 = vector.shape_cast %159 : vector<1x1x16xf32> to vector<1x16xf32>
    %c0_77 = arith.constant 0 : index
    %c0_78 = arith.constant 0 : index
    %c0_79 = arith.constant 0 : index
    %161 = vector.load %arg19[%c0_77, %c0_78, %c0_79] : memref<1x32x16xbf16, #tpu.memory_space<vmem>>, vector<1x32x16xbf16>
    %162 = vector.shape_cast %161 : vector<1x32x16xbf16> to vector<32x16xbf16>
    %c0_80 = arith.constant 0 : index
    %c0_81 = arith.constant 0 : index
    %c0_82 = arith.constant 0 : index
    %163 = vector.load %arg20[%c0_80, %c0_81, %c0_82] : memref<1x1x16xf32, #tpu.memory_space<vmem>>, vector<1x1x16xf32>
    %164 = vector.shape_cast %163 : vector<1x1x16xf32> to vector<1x16xf32>
    %c0_83 = arith.constant 0 : index
    %c0_84 = arith.constant 0 : index
    %c0_85 = arith.constant 0 : index
    %165 = vector.load %arg21[%c0_83, %c0_84, %c0_85] : memref<1x32x16xbf16, #tpu.memory_space<vmem>>, vector<1x32x16xbf16>
    %166 = vector.shape_cast %165 : vector<1x32x16xbf16> to vector<32x16xbf16>
    %c0_86 = arith.constant 0 : index
    %c0_87 = arith.constant 0 : index
    %c0_88 = arith.constant 0 : index
    %167 = vector.load %arg22[%c0_86, %c0_87, %c0_88] : memref<1x1x16xf32, #tpu.memory_space<vmem>>, vector<1x1x16xf32>
    %168 = vector.shape_cast %167 : vector<1x1x16xf32> to vector<1x16xf32>
    %c0_89 = arith.constant 0 : index
    %c0_90 = arith.constant 0 : index
    %c0_91 = arith.constant 0 : index
    %169 = vector.load %arg23[%c0_89, %c0_90, %c0_91] : memref<1x16x32xbf16, #tpu.memory_space<vmem>>, vector<1x16x32xbf16>
    %170 = vector.shape_cast %169 : vector<1x16x32xbf16> to vector<16x32xbf16>
    %c0_92 = arith.constant 0 : index
    %c0_93 = arith.constant 0 : index
    %c0_94 = arith.constant 0 : index
    %171 = vector.load %arg24[%c0_92, %c0_93, %c0_94] : memref<1x1x32xf32, #tpu.memory_space<vmem>>, vector<1x1x32xf32>
    %172 = vector.shape_cast %171 : vector<1x1x32xf32> to vector<1x32xf32>
    %173 = vector.shape_cast %156 : vector<2x8x32xf32> to vector<16x32xf32>
    %174 = arith.truncf %173 : vector<16x32xf32> to vector<16x32xbf16>
    %175 = vector.shape_cast %4 : vector<2x8x32xf32> to vector<16x32xf32>
    %176 = arith.truncf %175 : vector<16x32xf32> to vector<16x32xbf16>
    %cst_95 = arith.constant dense<0.000000e+00> : vector<16x16xf32>
    %177 = tpu.matmul %174, %158, %cst_95 {dimension_numbers = #tpu.dot_dimension_numbers<[1], [0], [0], [1], [0, 0, 1, 1], [], []>} : vector<16x32xbf16>, vector<32x16xbf16>, vector<16x16xf32> -> vector<16x16xf32>
    %178 = vector.broadcast %160 : vector<1x16xf32> to vector<16x16xf32>
    %179 = arith.addf %177, %178 : vector<16x16xf32>
    %cst_96 = arith.constant dense<0.000000e+00> : vector<16x16xf32>
    %180 = tpu.matmul %176, %162, %cst_96 {dimension_numbers = #tpu.dot_dimension_numbers<[1], [0], [0], [1], [0, 0, 1, 1], [], []>} : vector<16x32xbf16>, vector<32x16xbf16>, vector<16x16xf32> -> vector<16x16xf32>
    %181 = vector.broadcast %164 : vector<1x16xf32> to vector<16x16xf32>
    %182 = arith.addf %180, %181 : vector<16x16xf32>
    %cst_97 = arith.constant dense<0.000000e+00> : vector<16x16xf32>
    %183 = tpu.matmul %176, %166, %cst_97 {dimension_numbers = #tpu.dot_dimension_numbers<[1], [0], [0], [1], [0, 0, 1, 1], [], []>} : vector<16x32xbf16>, vector<32x16xbf16>, vector<16x16xf32> -> vector<16x16xf32>
    %184 = vector.broadcast %168 : vector<1x16xf32> to vector<16x16xf32>
    %185 = arith.addf %183, %184 : vector<16x16xf32>
    %186 = vector.shape_cast %179 : vector<16x16xf32> to vector<2x8x16xf32>
    %187 = arith.truncf %186 : vector<2x8x16xf32> to vector<2x8x16xbf16>
    %188 = vector.shape_cast %182 : vector<16x16xf32> to vector<2x8x16xf32>
    %189 = arith.truncf %188 : vector<2x8x16xf32> to vector<2x8x16xbf16>
    %190 = vector.shape_cast %185 : vector<16x16xf32> to vector<2x8x16xf32>
    %191 = arith.truncf %190 : vector<2x8x16xf32> to vector<2x8x16xbf16>
    %192 = vector.extract_strided_slice %187 {offsets = [0, 0, 0], sizes = [2, 8, 8], strides = [1, 1, 1]} : vector<2x8x16xbf16> to vector<2x8x8xbf16>
    %193 = vector.extract_strided_slice %189 {offsets = [0, 0, 0], sizes = [2, 8, 8], strides = [1, 1, 1]} : vector<2x8x16xbf16> to vector<2x8x8xbf16>
    %194 = vector.extract_strided_slice %191 {offsets = [0, 0, 0], sizes = [2, 8, 8], strides = [1, 1, 1]} : vector<2x8x16xbf16> to vector<2x8x8xbf16>
    "tpu.trace_start"() <{level = 10 : i32, message = "bqd,bkd->bqk"}> : () -> ()
    %cst_98 = arith.constant dense<0.000000e+00> : vector<2x8x8xf32>
    %195 = tpu.matmul %192, %193, %cst_98 {dimension_numbers = #tpu.dot_dimension_numbers<[2], [2], [1], [1], [0, 0, 0, 1, 1, 1], [0], [0]>} : vector<2x8x8xbf16>, vector<2x8x8xbf16>, vector<2x8x8xf32> -> vector<2x8x8xf32>
    %cst_99 = arith.constant -1.000000e+09 : f32
    "tpu.trace_stop"() : () -> ()
    %196 = vector.broadcast %cst_99 : f32 to vector<2x8x8xf32>
    %197 = arith.select %21, %195, %196 : vector<2x8x8xi1>, vector<2x8x8xf32>
    %cst_100 = arith.constant dense<0xFF800000> : vector<2x8xf32>
    %198 = vector.multi_reduction <maximumf>, %197, %cst_100 [2] : vector<2x8x8xf32> to vector<2x8xf32>
    %199 = vector.shape_cast %198 : vector<2x8xf32> to vector<2x8x1xf32>
    %200 = vector.broadcast %199 : vector<2x8x1xf32> to vector<2x8x8xf32>
    %201 = arith.subf %197, %200 : vector<2x8x8xf32>
    %202 = math.exp %201 : vector<2x8x8xf32>
    %cst_101 = arith.constant dense<0.000000e+00> : vector<2x8xf32>
    %203 = vector.multi_reduction <add>, %202, %cst_101 [2] : vector<2x8x8xf32> to vector<2x8xf32>
    %204 = vector.shape_cast %203 : vector<2x8xf32> to vector<2x8x1xf32>
    %205 = tpu.reciprocal %204 {approx = true} : vector<2x8x1xf32> -> vector<2x8x1xf32>
    %206 = vector.broadcast %205 : vector<2x8x1xf32> to vector<2x8x8xf32>
    %207 = arith.mulf %202, %206 : vector<2x8x8xf32>
    %208 = arith.truncf %207 : vector<2x8x8xf32> to vector<2x8x8xbf16>
    "tpu.trace_start"() <{level = 10 : i32, message = "bqk,bkd->bqd"}> : () -> ()
    %cst_102 = arith.constant dense<0.000000e+00> : vector<2x8x8xf32>
    %209 = tpu.matmul %208, %194, %cst_102 {dimension_numbers = #tpu.dot_dimension_numbers<[2], [1], [1], [2], [0, 0, 0, 1, 1, 2], [0], [0]>} : vector<2x8x8xbf16>, vector<2x8x8xbf16>, vector<2x8x8xf32> -> vector<2x8x8xf32>
    "tpu.trace_stop"() : () -> ()
    %210 = vector.extract_strided_slice %187 {offsets = [0, 0, 8], sizes = [2, 8, 8], strides = [1, 1, 1]} : vector<2x8x16xbf16> to vector<2x8x8xbf16>
    %211 = vector.extract_strided_slice %189 {offsets = [0, 0, 8], sizes = [2, 8, 8], strides = [1, 1, 1]} : vector<2x8x16xbf16> to vector<2x8x8xbf16>
    %212 = vector.extract_strided_slice %191 {offsets = [0, 0, 8], sizes = [2, 8, 8], strides = [1, 1, 1]} : vector<2x8x16xbf16> to vector<2x8x8xbf16>
    "tpu.trace_start"() <{level = 10 : i32, message = "bqd,bkd->bqk"}> : () -> ()
    %cst_103 = arith.constant dense<0.000000e+00> : vector<2x8x8xf32>
    %213 = tpu.matmul %210, %211, %cst_103 {dimension_numbers = #tpu.dot_dimension_numbers<[2], [2], [1], [1], [0, 0, 0, 1, 1, 1], [0], [0]>} : vector<2x8x8xbf16>, vector<2x8x8xbf16>, vector<2x8x8xf32> -> vector<2x8x8xf32>
    %cst_104 = arith.constant -1.000000e+09 : f32
    "tpu.trace_stop"() : () -> ()
    %214 = vector.broadcast %cst_104 : f32 to vector<2x8x8xf32>
    %215 = arith.select %21, %213, %214 : vector<2x8x8xi1>, vector<2x8x8xf32>
    %cst_105 = arith.constant dense<0xFF800000> : vector<2x8xf32>
    %216 = vector.multi_reduction <maximumf>, %215, %cst_105 [2] : vector<2x8x8xf32> to vector<2x8xf32>
    %217 = vector.shape_cast %216 : vector<2x8xf32> to vector<2x8x1xf32>
    %218 = vector.broadcast %217 : vector<2x8x1xf32> to vector<2x8x8xf32>
    %219 = arith.subf %215, %218 : vector<2x8x8xf32>
    %220 = math.exp %219 : vector<2x8x8xf32>
    %cst_106 = arith.constant dense<0.000000e+00> : vector<2x8xf32>
    %221 = vector.multi_reduction <add>, %220, %cst_106 [2] : vector<2x8x8xf32> to vector<2x8xf32>
    %222 = vector.shape_cast %221 : vector<2x8xf32> to vector<2x8x1xf32>
    %223 = tpu.reciprocal %222 {approx = true} : vector<2x8x1xf32> -> vector<2x8x1xf32>
    %224 = vector.broadcast %223 : vector<2x8x1xf32> to vector<2x8x8xf32>
    %225 = arith.mulf %220, %224 : vector<2x8x8xf32>
    %226 = arith.truncf %225 : vector<2x8x8xf32> to vector<2x8x8xbf16>
    "tpu.trace_start"() <{level = 10 : i32, message = "bqk,bkd->bqd"}> : () -> ()
    %cst_107 = arith.constant dense<0.000000e+00> : vector<2x8x8xf32>
    %227 = tpu.matmul %226, %212, %cst_107 {dimension_numbers = #tpu.dot_dimension_numbers<[2], [1], [1], [2], [0, 0, 0, 1, 1, 2], [0], [0]>} : vector<2x8x8xbf16>, vector<2x8x8xbf16>, vector<2x8x8xf32> -> vector<2x8x8xf32>
    "tpu.trace_stop"() : () -> ()
    %228 = tpu.concatenate %209, %227 in 2 : vector<2x8x8xf32>, vector<2x8x8xf32> -> vector<2x8x16xf32>
    %229 = vector.shape_cast %228 : vector<2x8x16xf32> to vector<16x16xf32>
    %230 = arith.truncf %229 : vector<16x16xf32> to vector<16x16xbf16>
    %cst_108 = arith.constant dense<0.000000e+00> : vector<16x32xf32>
    %231 = tpu.matmul %230, %170, %cst_108 {dimension_numbers = #tpu.dot_dimension_numbers<[1], [0], [0], [1], [0, 0, 1, 1], [], []>} : vector<16x16xbf16>, vector<16x32xbf16>, vector<16x32xf32> -> vector<16x32xf32>
    %232 = vector.broadcast %172 : vector<1x32xf32> to vector<16x32xf32>
    %233 = arith.addf %231, %232 : vector<16x32xf32>
    %234 = vector.shape_cast %233 : vector<16x32xf32> to vector<2x8x32xf32>
    %235 = arith.addf %156, %234 : vector<2x8x32xf32>
    %c0_109 = arith.constant 0 : index
    %c0_110 = arith.constant 0 : index
    %c0_111 = arith.constant 0 : index
    %236 = vector.load %arg25[%c0_109, %c0_110, %c0_111] : memref<1x1x32xf32, #tpu.memory_space<vmem>>, vector<1x1x32xf32>
    %237 = vector.shape_cast %236 : vector<1x1x32xf32> to vector<1x32xf32>
    %c0_112 = arith.constant 0 : index
    %c0_113 = arith.constant 0 : index
    %c0_114 = arith.constant 0 : index
    %238 = vector.load %arg26[%c0_112, %c0_113, %c0_114] : memref<1x1x32xf32, #tpu.memory_space<vmem>>, vector<1x1x32xf32>
    %239 = vector.shape_cast %238 : vector<1x1x32xf32> to vector<1x32xf32>
    %cst_115 = arith.constant dense<0.000000e+00> : vector<2x8xf32>
    %240 = vector.multi_reduction <add>, %235, %cst_115 [2] : vector<2x8x32xf32> to vector<2x8xf32>
    %241 = vector.shape_cast %240 : vector<2x8xf32> to vector<2x8x1xf32>
    %cst_116 = arith.constant 3.200000e+01 : f32
    %242 = vector.broadcast %cst_116 : f32 to vector<2x8x1xf32>
    %243 = arith.divf %241, %242 : vector<2x8x1xf32>
    %244 = vector.broadcast %243 : vector<2x8x1xf32> to vector<2x8x32xf32>
    %245 = arith.subf %235, %244 : vector<2x8x32xf32>
    %246 = arith.mulf %245, %245 : vector<2x8x32xf32>
    %cst_117 = arith.constant dense<0.000000e+00> : vector<2x8xf32>
    %247 = vector.multi_reduction <add>, %246, %cst_117 [2] : vector<2x8x32xf32> to vector<2x8xf32>
    %248 = vector.shape_cast %247 : vector<2x8xf32> to vector<2x8x1xf32>
    %cst_118 = arith.constant 3.200000e+01 : f32
    %249 = vector.broadcast %cst_118 : f32 to vector<2x8x1xf32>
    %250 = arith.divf %248, %249 : vector<2x8x1xf32>
    %251 = vector.broadcast %243 : vector<2x8x1xf32> to vector<2x8x32xf32>
    %252 = arith.subf %235, %251 : vector<2x8x32xf32>
    %253 = vector.shape_cast %237 : vector<1x32xf32> to vector<1x1x32xf32>
    %254 = vector.broadcast %253 : vector<1x1x32xf32> to vector<2x8x32xf32>
    %255 = arith.mulf %254, %252 : vector<2x8x32xf32>
    %cst_119 = arith.constant 9.99999997E-7 : f32
    %256 = vector.broadcast %cst_119 : f32 to vector<2x8x1xf32>
    %257 = arith.addf %250, %256 : vector<2x8x1xf32>
    %258 = math.rsqrt %257 : vector<2x8x1xf32>
    %259 = vector.broadcast %258 : vector<2x8x1xf32> to vector<2x8x32xf32>
    %260 = arith.mulf %255, %259 : vector<2x8x32xf32>
    %261 = vector.shape_cast %239 : vector<1x32xf32> to vector<1x1x32xf32>
    %262 = vector.broadcast %261 : vector<1x1x32xf32> to vector<2x8x32xf32>
    %263 = arith.addf %260, %262 : vector<2x8x32xf32>
    %264 = vector.shape_cast %263 : vector<2x8x32xf32> to vector<16x32xf32>
    %265 = arith.truncf %264 : vector<16x32xf32> to vector<16x32xbf16>
    %c0_120 = arith.constant 0 : index
    %c0_121 = arith.constant 0 : index
    %c0_122 = arith.constant 0 : index
    %266 = vector.load %arg27[%c0_120, %c0_121, %c0_122] : memref<1x32x64xbf16, #tpu.memory_space<vmem>>, vector<1x32x64xbf16>
    %267 = vector.shape_cast %266 : vector<1x32x64xbf16> to vector<32x64xbf16>
    %cst_123 = arith.constant dense<0.000000e+00> : vector<16x64xf32>
    %268 = tpu.matmul %265, %267, %cst_123 {dimension_numbers = #tpu.dot_dimension_numbers<[1], [0], [0], [1], [0, 0, 1, 1], [], []>} : vector<16x32xbf16>, vector<32x64xbf16>, vector<16x64xf32> -> vector<16x64xf32>
    %c0_124 = arith.constant 0 : index
    %c0_125 = arith.constant 0 : index
    %c0_126 = arith.constant 0 : index
    %269 = vector.load %arg28[%c0_124, %c0_125, %c0_126] : memref<1x1x64xf32, #tpu.memory_space<vmem>>, vector<1x1x64xf32>
    %270 = vector.shape_cast %269 : vector<1x1x64xf32> to vector<1x64xf32>
    %271 = vector.broadcast %270 : vector<1x64xf32> to vector<16x64xf32>
    %272 = arith.addf %268, %271 : vector<16x64xf32>
    %cst_127 = arith.constant 0.000000e+00 : f32
    %273 = vector.broadcast %cst_127 : f32 to vector<16x64xf32>
    %274 = arith.maximumf %272, %273 : vector<16x64xf32>
    %275 = arith.truncf %274 : vector<16x64xf32> to vector<16x64xbf16>
    %c0_128 = arith.constant 0 : index
    %c0_129 = arith.constant 0 : index
    %c0_130 = arith.constant 0 : index
    %276 = vector.load %arg29[%c0_128, %c0_129, %c0_130] : memref<1x64x32xbf16, #tpu.memory_space<vmem>>, vector<1x64x32xbf16>
    %277 = vector.shape_cast %276 : vector<1x64x32xbf16> to vector<64x32xbf16>
    %cst_131 = arith.constant dense<0.000000e+00> : vector<16x32xf32>
    %278 = tpu.matmul %275, %277, %cst_131 {dimension_numbers = #tpu.dot_dimension_numbers<[1], [0], [0], [1], [0, 0, 1, 1], [], []>} : vector<16x64xbf16>, vector<64x32xbf16>, vector<16x32xf32> -> vector<16x32xf32>
    %c0_132 = arith.constant 0 : index
    %c0_133 = arith.constant 0 : index
    %c0_134 = arith.constant 0 : index
    %279 = vector.load %arg30[%c0_132, %c0_133, %c0_134] : memref<1x1x32xf32, #tpu.memory_space<vmem>>, vector<1x1x32xf32>
    %280 = vector.shape_cast %279 : vector<1x1x32xf32> to vector<1x32xf32>
    %281 = vector.broadcast %280 : vector<1x32xf32> to vector<16x32xf32>
    %282 = arith.addf %278, %281 : vector<16x32xf32>
    %283 = vector.shape_cast %282 : vector<16x32xf32> to vector<2x8x32xf32>
    %284 = arith.addf %263, %283 : vector<2x8x32xf32>
    %c0_135 = arith.constant 0 : index
    %c0_136 = arith.constant 0 : index
    %c0_137 = arith.constant 0 : index
    %285 = vector.load %arg34[%c0_135, %c0_136, %c0_137] : memref<2x8x32xf32, #tpu.memory_space<vmem>>, vector<2x8x32xf32>
    tpu.vector_store %arg34[%c0_135, %c0_136, %c0_137], %284 {strides = array<i32>} : memref<2x8x32xf32, #tpu.memory_space<vmem>>, vector<2x8x32xf32>,
    %c1_i32 = arith.constant 1 : i32
    %286 = arith.cmpi eq, %arg0, %c1_i32 : i32
    %287 = arith.extui %286 : i1 to i32
    %c0_i32_138 = arith.constant 0 : i32
    %288 = arith.cmpi ne, %287, %c0_i32_138 : i32
    scf.if %288 {
      %c0_139 = arith.constant 0 : index
      %c0_140 = arith.constant 0 : index
      %289 = vector.load %arg31[%c0_139, %c0_140] : memref<1x32xf32, #tpu.memory_space<vmem>>, vector<1x32xf32>
      %c0_141 = arith.constant 0 : index
      %c0_142 = arith.constant 0 : index
      %290 = vector.load %arg32[%c0_141, %c0_142] : memref<1x32xf32, #tpu.memory_space<vmem>>, vector<1x32xf32>
      %cst_143 = arith.constant dense<0.000000e+00> : vector<2x8xf32>
      %291 = vector.multi_reduction <add>, %284, %cst_143 [2] : vector<2x8x32xf32> to vector<2x8xf32>
      %292 = vector.shape_cast %291 : vector<2x8xf32> to vector<2x8x1xf32>
      %cst_144 = arith.constant 3.200000e+01 : f32
      %293 = vector.broadcast %cst_144 : f32 to vector<2x8x1xf32>
      %294 = arith.divf %292, %293 : vector<2x8x1xf32>
      %295 = vector.broadcast %294 : vector<2x8x1xf32> to vector<2x8x32xf32>
      %296 = arith.subf %284, %295 : vector<2x8x32xf32>
      %297 = arith.mulf %296, %296 : vector<2x8x32xf32>
      %cst_145 = arith.constant dense<0.000000e+00> : vector<2x8xf32>
      %298 = vector.multi_reduction <add>, %297, %cst_145 [2] : vector<2x8x32xf32> to vector<2x8xf32>
      %299 = vector.shape_cast %298 : vector<2x8xf32> to vector<2x8x1xf32>
      %cst_146 = arith.constant 3.200000e+01 : f32
      %300 = vector.broadcast %cst_146 : f32 to vector<2x8x1xf32>
      %301 = arith.divf %299, %300 : vector<2x8x1xf32>
      %302 = vector.broadcast %294 : vector<2x8x1xf32> to vector<2x8x32xf32>
      %303 = arith.subf %284, %302 : vector<2x8x32xf32>
      %304 = vector.shape_cast %289 : vector<1x32xf32> to vector<1x1x32xf32>
      %305 = vector.broadcast %304 : vector<1x1x32xf32> to vector<2x8x32xf32>
      %306 = arith.mulf %305, %303 : vector<2x8x32xf32>
      %cst_147 = arith.constant 9.99999997E-7 : f32
      %307 = vector.broadcast %cst_147 : f32 to vector<2x8x1xf32>
      %308 = arith.addf %301, %307 : vector<2x8x1xf32>
      %309 = math.rsqrt %308 : vector<2x8x1xf32>
      %310 = vector.broadcast %309 : vector<2x8x1xf32> to vector<2x8x32xf32>
      %311 = arith.mulf %306, %310 : vector<2x8x32xf32>
      %312 = vector.shape_cast %290 : vector<1x32xf32> to vector<1x1x32xf32>
      %313 = vector.broadcast %312 : vector<1x1x32xf32> to vector<2x8x32xf32>
      %314 = arith.addf %311, %313 : vector<2x8x32xf32>
      %c0_148 = arith.constant 0 : index
      %c0_149 = arith.constant 0 : index
      %c0_150 = arith.constant 0 : index
      %315 = vector.load %arg33[%c0_148, %c0_149, %c0_150] : memref<2x8x32xf32, #tpu.memory_space<vmem>>, vector<2x8x32xf32>
      tpu.vector_store %arg33[%c0_148, %c0_149, %c0_150], %314 {strides = array<i32>} : memref<2x8x32xf32, #tpu.memory_space<vmem>>, vector<2x8x32xf32>,
    } else {
    }
    return
  }
  func.func @transform_0(%arg0: i32) -> (i32, i32, i32) {
    %c0_i32 = arith.constant 0 : i32
    %c0_i32_0 = arith.constant 0 : i32
    %c0_i32_1 = arith.constant 0 : i32
    %c0_i32_2 = arith.constant 0 : i32
    return %c0_i32, %c0_i32_0, %c0_i32_1 : i32, i32, i32
  }
  func.func @transform_1(%arg0: i32) -> (i32, i32, i32) {
    %c0_i32 = arith.constant 0 : i32
    %c0_i32_0 = arith.constant 0 : i32
    %c0_i32_1 = arith.constant 0 : i32
    %c0_i32_2 = arith.constant 0 : i32
    return %c0_i32, %c0_i32_0, %c0_i32_1 : i32, i32, i32
  }
  func.func @transform_2(%arg0: i32) -> (i32, i32, i32) {
    %c0_i32 = arith.constant 0 : i32
    %c0_i32_0 = arith.constant 0 : i32
    %c0_i32_1 = arith.constant 0 : i32
    %c0_i32_2 = arith.constant 0 : i32
    return %c0_i32, %c0_i32_0, %c0_i32_1 : i32, i32, i32
  }
  func.func @transform_3(%arg0: i32) -> (i32, i32, i32) {
    %c0_i32 = arith.constant 0 : i32
    %c0_i32_0 = arith.constant 0 : i32
    %c0_i32_1 = arith.constant 0 : i32
    %c0_i32_2 = arith.constant 0 : i32
    return %c0_i32, %c0_i32_0, %c0_i32_1 : i32, i32, i32
  }
  func.func @transform_4(%arg0: i32) -> (i32, i32, i32) {
    %c0_i32 = arith.constant 0 : i32
    %c0_i32_0 = arith.constant 0 : i32
    %c0_i32_1 = arith.constant 0 : i32
    return %arg0, %c0_i32, %c0_i32_0 : i32, i32, i32
  }
  func.func @transform_5(%arg0: i32) -> (i32, i32, i32) {
    %c0_i32 = arith.constant 0 : i32
    %c0_i32_0 = arith.constant 0 : i32
    %c0_i32_1 = arith.constant 0 : i32
    return %arg0, %c0_i32, %c0_i32_0 : i32, i32, i32
  }
  func.func @transform_6(%arg0: i32) -> (i32, i32, i32) {
    %c0_i32 = arith.constant 0 : i32
    %c0_i32_0 = arith.constant 0 : i32
    %c0_i32_1 = arith.constant 0 : i32
    return %arg0, %c0_i32, %c0_i32_0 : i32, i32, i32
  }
  func.func @transform_7(%arg0: i32) -> (i32, i32, i32) {
    %c0_i32 = arith.constant 0 : i32
    %c0_i32_0 = arith.constant 0 : i32
    %c0_i32_1 = arith.constant 0 : i32
    return %arg0, %c0_i32, %c0_i32_0 : i32, i32, i32
  }
  func.func @transform_8(%arg0: i32) -> (i32, i32, i32) {
    %c0_i32 = arith.constant 0 : i32
    %c0_i32_0 = arith.constant 0 : i32
    %c0_i32_1 = arith.constant 0 : i32
    return %arg0, %c0_i32, %c0_i32_0 : i32, i32, i32
  }
  func.func @transform_9(%arg0: i32) -> (i32, i32, i32) {
    %c0_i32 = arith.constant 0 : i32
    %c0_i32_0 = arith.constant 0 : i32
    %c0_i32_1 = arith.constant 0 : i32
    return %arg0, %c0_i32, %c0_i32_0 : i32, i32, i32
  }
  func.func @transform_10(%arg0: i32) -> (i32, i32, i32) {
    %c0_i32 = arith.constant 0 : i32
    %c0_i32_0 = arith.constant 0 : i32
    %c0_i32_1 = arith.constant 0 : i32
    return %arg0, %c0_i32, %c0_i32_0 : i32, i32, i32
  }
  func.func @transform_11(%arg0: i32) -> (i32, i32, i32) {
    %c0_i32 = arith.constant 0 : i32
    %c0_i32_0 = arith.constant 0 : i32
    %c0_i32_1 = arith.constant 0 : i32
    return %arg0, %c0_i32, %c0_i32_0 : i32, i32, i32
  }
  func.func @transform_12(%arg0: i32) -> (i32, i32, i32) {
    %c0_i32 = arith.constant 0 : i32
    %c0_i32_0 = arith.constant 0 : i32
    %c0_i32_1 = arith.constant 0 : i32
    return %arg0, %c0_i32, %c0_i32_0 : i32, i32, i32
  }
  func.func @transform_13(%arg0: i32) -> (i32, i32, i32) {
    %c0_i32 = arith.constant 0 : i32
    %c0_i32_0 = arith.constant 0 : i32
    %c0_i32_1 = arith.constant 0 : i32
    return %arg0, %c0_i32, %c0_i32_0 : i32, i32, i32
  }
  func.func @transform_14(%arg0: i32) -> (i32, i32, i32) {
    %c0_i32 = arith.constant 0 : i32
    %c0_i32_0 = arith.constant 0 : i32
    %c0_i32_1 = arith.constant 0 : i32
    return %arg0, %c0_i32, %c0_i32_0 : i32, i32, i32
  }
  func.func @transform_15(%arg0: i32) -> (i32, i32, i32) {
    %c0_i32 = arith.constant 0 : i32
    %c0_i32_0 = arith.constant 0 : i32
    %c0_i32_1 = arith.constant 0 : i32
    return %arg0, %c0_i32, %c0_i32_0 : i32, i32, i32
  }
  func.func @transform_16(%arg0: i32) -> (i32, i32, i32) {
    %c0_i32 = arith.constant 0 : i32
    %c0_i32_0 = arith.constant 0 : i32
    %c0_i32_1 = arith.constant 0 : i32
    return %arg0, %c0_i32, %c0_i32_0 : i32, i32, i32
  }
  func.func @transform_17(%arg0: i32) -> (i32, i32, i32) {
    %c0_i32 = arith.constant 0 : i32
    %c0_i32_0 = arith.constant 0 : i32
    %c0_i32_1 = arith.constant 0 : i32
    return %arg0, %c0_i32, %c0_i32_0 : i32, i32, i32
  }
  func.func @transform_18(%arg0: i32) -> (i32, i32, i32) {
    %c0_i32 = arith.constant 0 : i32
    %c0_i32_0 = arith.constant 0 : i32
    %c0_i32_1 = arith.constant 0 : i32
    return %arg0, %c0_i32, %c0_i32_0 : i32, i32, i32
  }
  func.func @transform_19(%arg0: i32) -> (i32, i32, i32) {
    %c0_i32 = arith.constant 0 : i32
    %c0_i32_0 = arith.constant 0 : i32
    %c0_i32_1 = arith.constant 0 : i32
    return %arg0, %c0_i32, %c0_i32_0 : i32, i32, i32
  }
  func.func @transform_20(%arg0: i32) -> (i32, i32, i32) {
    %c0_i32 = arith.constant 0 : i32
    %c0_i32_0 = arith.constant 0 : i32
    %c0_i32_1 = arith.constant 0 : i32
    return %arg0, %c0_i32, %c0_i32_0 : i32, i32, i32
  }
  func.func @transform_21(%arg0: i32) -> (i32, i32, i32) {
    %c0_i32 = arith.constant 0 : i32
    %c0_i32_0 = arith.constant 0 : i32
    %c0_i32_1 = arith.constant 0 : i32
    return %arg0, %c0_i32, %c0_i32_0 : i32, i32, i32
  }
  func.func @transform_22(%arg0: i32) -> (i32, i32, i32) {
    %c0_i32 = arith.constant 0 : i32
    %c0_i32_0 = arith.constant 0 : i32
    %c0_i32_1 = arith.constant 0 : i32
    return %arg0, %c0_i32, %c0_i32_0 : i32, i32, i32
  }
  func.func @transform_23(%arg0: i32) -> (i32, i32, i32) {
    %c0_i32 = arith.constant 0 : i32
    %c0_i32_0 = arith.constant 0 : i32
    %c0_i32_1 = arith.constant 0 : i32
    return %arg0, %c0_i32, %c0_i32_0 : i32, i32, i32
  }
  func.func @transform_24(%arg0: i32) -> (i32, i32, i32) {
    %c0_i32 = arith.constant 0 : i32
    %c0_i32_0 = arith.constant 0 : i32
    %c0_i32_1 = arith.constant 0 : i32
    return %arg0, %c0_i32, %c0_i32_0 : i32, i32, i32
  }
  func.func @transform_25(%arg0: i32) -> (i32, i32, i32) {
    %c0_i32 = arith.constant 0 : i32
    %c0_i32_0 = arith.constant 0 : i32
    %c0_i32_1 = arith.constant 0 : i32
    return %arg0, %c0_i32, %c0_i32_0 : i32, i32, i32
  }
  func.func @transform_26(%arg0: i32) -> (i32, i32, i32) {
    %c0_i32 = arith.constant 0 : i32
    %c0_i32_0 = arith.constant 0 : i32
    %c0_i32_1 = arith.constant 0 : i32
    return %arg0, %c0_i32, %c0_i32_0 : i32, i32, i32
  }
  func.func @transform_27(%arg0: i32) -> (i32, i32, i32) {
    %c0_i32 = arith.constant 0 : i32
    %c0_i32_0 = arith.constant 0 : i32
    %c0_i32_1 = arith.constant 0 : i32
    return %arg0, %c0_i32, %c0_i32_0 : i32, i32, i32
  }
  func.func @transform_28(%arg0: i32) -> (i32, i32, i32) {
    %c0_i32 = arith.constant 0 : i32
    %c0_i32_0 = arith.constant 0 : i32
    %c0_i32_1 = arith.constant 0 : i32
    return %arg0, %c0_i32, %c0_i32_0 : i32, i32, i32
  }
  func.func @transform_29(%arg0: i32) -> (i32, i32, i32) {
    %c0_i32 = arith.constant 0 : i32
    %c0_i32_0 = arith.constant 0 : i32
    %c0_i32_1 = arith.constant 0 : i32
    return %arg0, %c0_i32, %c0_i32_0 : i32, i32, i32
  }
  func.func @transform_30(%arg0: i32) -> (i32, i32) {
    %c0_i32 = arith.constant 0 : i32
    %c0_i32_0 = arith.constant 0 : i32
    %c0_i32_1 = arith.constant 0 : i32
    return %c0_i32, %c0_i32_0 : i32, i32
  }
  func.func @transform_31(%arg0: i32) -> (i32, i32) {
    %c0_i32 = arith.constant 0 : i32
    %c0_i32_0 = arith.constant 0 : i32
    %c0_i32_1 = arith.constant 0 : i32
    return %c0_i32, %c0_i32_0 : i32, i32
  }
  func.func @transform_32(%arg0: i32) -> (i32, i32, i32) {
    %c0_i32 = arith.constant 0 : i32
    %c0_i32_0 = arith.constant 0 : i32
    %c0_i32_1 = arith.constant 0 : i32
    %c0_i32_2 = arith.constant 0 : i32
    return %c0_i32, %c0_i32_0, %c0_i32_1 : i32, i32, i32
  }
}

</mosaic_0001>

<bundles_post_ra>
// kernel: tpu_custom_call.1
= control target key start
LH: loop header
LB: loop body
LE: loop exit
PB: predicated region body
PF: predicated region fallthrough
CT: control target
= control target key end

     0   :  { %s4059_s6 = smov 1   ;;  %s4060_s10 = smov 2   ;;  %s4718_s0 = inlined_call_operand.smem [shape: u32[33], index: -1, kind: input, shape index: {}] }
   0x1   :  { %s4106_s5 = sld [smem:[%s4718_s0]]   ;;  %s4061_s14 = smov 3  }
   0x2   :  { %s4111_s9 = sld [smem:[%s4718_s0 + %s4059_s6]]   ;;  %s4062_s18 = smov 4  }
   0x3   :  { %s4116_s13 = sld [smem:[%s4718_s0 + %s4060_s10]]   ;;  %s4063_s22 = smov 5  }
   0x4   :  { %s4121_s17 = sld [smem:[%s4718_s0 + %s4061_s14]]   ;;  %s4064_s26 = smov 6  }
   0x5   :  { %s4126_s21 = sld [smem:[%s4718_s0 + %s4062_s18]]   ;;  %s4065_s30 = smov 7  }
   0x6   :  { %s4131_s25 = sld [smem:[%s4718_s0 + %s4063_s22]]   ;;  %s4066_s4 = smov 8  }
   0x7   :  { %4731 = sst [smem:[#allocation6_spill]] %s4106_s5  ;;  %s4067_s10 = smov 9  }
   0x8   :  { %4732 = sst [smem:[#allocation7_spill]] %s4111_s9  ;;  %s4068_s15 = smov 10  }
   0x9   :  { %4733 = sst [smem:[#allocation8_spill]] %s4116_s13  ;;  %s4069_s20 = smov 11  }
   0xa   :  { %4734 = sst [smem:[#allocation9_spill]] %s4121_s17  ;;  %s4071_s1 = smov 13  }
   0xb   :  { %4735 = sst [smem:[#allocation10_spill]] %s4126_s21  ;;  %s4072_s7 = smov 14  }
   0xc   :  { %4736 = sst [smem:[#allocation11_spill]] %s4131_s25  ;;  %s4074_s22 = smov 16  }
   0xd   :  { %s4136_s29 = sld [smem:[%s4718_s0 + %s4064_s26]]   ;;  %s4070_s26 = smov 12  }
   0xe   :  { %s4141_s3 = sld [smem:[%s4718_s0 + %s4065_s30]]   ;;  %s4075_s28 = smov 17  }
   0xf   :  { %s4146_s8 = sld [smem:[%s4718_s0 + %s4066_s4]]  }
  0x10   :  { %s4151_s14 = sld [smem:[%s4718_s0 + %s4067_s10]]  }
  0x11   :  { %s4156_s19 = sld [smem:[%s4718_s0 + %s4068_s15]]   ;;  %s4073_s15 = smov 15  }
  0x12   :  { %s4161_s24 = sld [smem:[%s4718_s0 + %s4069_s20]]  }
  0x13   :  { %4737 = sst [smem:[#allocation12_spill]] %s4136_s29 }
  0x14   :  { %4738 = sst [smem:[#allocation13_spill]] %s4141_s3 }
  0x15   :  { %4739 = sst [smem:[#allocation14_spill]] %s4146_s8 }
  0x16   :  { %4740 = sst [smem:[#allocation15_spill]] %s4151_s14 }
  0x17   :  { %4741 = sst [smem:[#allocation16_spill]] %s4156_s19 }
  0x18   :  { %4742 = sst [smem:[#allocation17_spill]] %s4161_s24 }
  0x19   :  { %s4166_s30 = sld [smem:[%s4718_s0 + %s4070_s26]]  }
  0x1a   :  { %s4171_s6 = sld [smem:[%s4718_s0 + %s4071_s1]]  }
  0x1b   :  { %s4176_s12 = sld [smem:[%s4718_s0 + %s4072_s7]]   ;;  %s4076_s7 = smov 18  }
  0x1c   :  { %s4181_s20 = sld [smem:[%s4718_s0 + %s4073_s15]]   ;;  %s4077_s15 = smov 19  }
  0x1d   :  { %s4186_s27 = sld [smem:[%s4718_s0 + %s4074_s22]]   ;;  %s4078_s22 = smov 20  }
  0x1e   :  { %s4191_s4 = sld [smem:[%s4718_s0 + %s4075_s28]]   ;;  %s4079_s28 = smov 21  }
  0x1f   :  { %4743 = sst [smem:[#allocation18_spill]] %s4166_s30 }
  0x20   :  { %4744 = sst [smem:[#allocation19_spill]] %s4171_s6 }
  0x21   :  { %4745 = sst [smem:[#allocation20_spill]] %s4176_s12 }
  0x22   :  { %4746 = sst [smem:[#allocation21_spill]] %s4181_s20 }
  0x23   :  { %4747 = sst [smem:[#allocation22_spill]] %s4186_s27 }
  0x24   :  { %s4196_s9 = sld [smem:[%s4718_s0 + %s4076_s7]]   ;;  %s4080_s7 = smov 22  }
  0x25   :  { %s4201_s13 = sld [smem:[%s4718_s0 + %s4077_s15]]   ;;  %s4081_s15 = smov 23  }
  0x26   :  { %s4206_s17 = sld [smem:[%s4718_s0 + %s4078_s22]]   ;;  %s4082_s22 = smov 24  }
  0x27   :  { %s4211_s5 = sld [smem:[%s4718_s0 + %s4079_s28]]   ;;  %s4083_s28 = smov 25  }
  0x2a   :  { %4748 = sst [smem:[#allocation23_spill]] %s4196_s9 }
  0x2b   :  { %4749 = sst [smem:[#allocation24_spill]] %s4201_s13 }
  0x2c   :  { %4750 = sst [smem:[#allocation25_spill]] %s4206_s17 }
  0x2d   :  { %4751 = sst [smem:[#allocation26_spill]] %s4211_s5 }
  0x2e   :  { %s4216_s9 = sld [smem:[%s4718_s0 + %s4080_s7]]   ;;  %s4084_s7 = smov 26  }
  0x2f   :  { %s4221_s13 = sld [smem:[%s4718_s0 + %s4081_s15]]   ;;  %s4085_s15 = smov 27  }
  0x30   :  { %s4226_s17 = sld [smem:[%s4718_s0 + %s4082_s22]]   ;;  %s4086_s22 = smov 28  }
  0x31   :  { %s4231_s5 = sld [smem:[%s4718_s0 + %s4083_s28]]   ;;  %s4087_s28 = smov 29  }
  0x34   :  { %4752 = sst [smem:[#allocation27_spill]] %s4216_s9 }
  0x35   :  { %4753 = sst [smem:[#allocation28_spill]] %s4221_s13 }
  0x36   :  { %4754 = sst [smem:[#allocation29_spill]] %s4226_s17 }
  0x37   :  { %4755 = sst [smem:[#allocation30_spill]] %s4231_s5 }
  0x38   :  { %s4236_s9 = sld [smem:[%s4718_s0 + %s4084_s7]]   ;;  %s4088_s7 = smov 30  }
  0x39   :  { %s4241_s13 = sld [smem:[%s4718_s0 + %s4085_s15]]   ;;  %s4089_s15 = smov 31  }
  0x3a   :  { %s4246_s17 = sld [smem:[%s4718_s0 + %s4086_s22]]   ;;  %s4090_s22 = smov 32  }
  0x3b   :  { %s4251_s5 = sld [smem:[%s4718_s0 + %s4087_s28]]  }
  0x3e   :  { %4756 = sst [smem:[#allocation31_spill]] %s4236_s9 }
  0x3f   :  { %4757 = sst [smem:[#allocation32_spill]] %s4241_s13 }
  0x40   :  { %4758 = sst [smem:[#allocation33_spill]] %s4246_s17 }
  0x41   :  { %s4256_s9 = sld [smem:[%s4718_s0 + %s4088_s7]]  }
  0x42   :  { %s4261_s13 = sld [smem:[%s4718_s0 + %s4089_s15]]  }
  0x43   :  { %s4266_s17 = sld [smem:[%s4718_s0 + %s4090_s22]]  }
  0x47   :  { %4759 = sst [smem:[#allocation34_spill]] %s4256_s9 }
  0x48   :  { %4760 = sst [smem:[#allocation35_spill]] %s4261_s13 }
  0x49   :  { %4761 = sst [smem:[#allocation36_spill]] %s4266_s17 }
  0x4a   :  { %70 = vsyncpa [#allocation4], 0  ;;  %s4268_s28 = smov 0  }
  0x4b LB: > { %4762 = sst [smem:[#allocation37_spill]] %s4057_s28  ;;  %s4274_s1 = sadd.s32 4294967295, %s4057_s28   ;;  %s4057_s28 = sphi %s4268_s28, %s76_s28  }
  0x4c   : > { %4763 = sst [smem:[#allocation38_spill]] %s4274_s1  ;;  %p3545_p0 = scmp.ge.s32.totalorder %s4057_s28, 1 }
  0x4d   : > { %p1109_p1 = scmp.lt.s32.totalorder %s4057_s28, 3 }
  0x4f   : > { %p1110_p2 = pnand %p3545_p0, %p1109_p1 }
  0x51   : > { %1113 = sbr.rel (%p1110_p2) target bundleno = 5548 (0x15ac), region = 148 }
  0x58   : > { %s4767_s29 = sld [smem:[#allocation12_spill]]  ;;  %s4768_s8 = sld [smem:[#allocation14_spill]] }
  0x59   : > { %s4770_s19 = sld [smem:[#allocation16_spill]]  ;;  %s4772_s30 = sld [smem:[#allocation18_spill]] }
  0x5a   : > { %p1279_p3 = scmp.lt.s32.totalorder %s4274_s1, 1  ;;  %s4776_s27 = sld [smem:[#allocation22_spill]] }
  0x5b   : > { %s4777_s7 = sld [smem:[#allocation23_spill]]  ;;  %s4778_s11 = sld [smem:[#allocation24_spill]] }
  0x5c   : > { %s4280_s0 = scalar_select %p1279_p3, %s4274_s1, 1 }
  0x5d   : > { %s4779_s16 = sld [smem:[#allocation25_spill]]  ;;  %s4780_s22 = sld [smem:[#allocation26_spill]] }
  0x5e   : > { %s3640_s15 = sshll.u32 %s4280_s0, 4  ;;  %s4782_s26 = sld [smem:[#allocation27_spill]] }
  0x5f   : > { %s4290_s23 = scalar_lea.vmem %s4767_s29, %s3640_s15  ;;  %s4293_s28 = scalar_lea.vmem %s4768_s8, %s3640_s15 }
  0x60   : > { %4781 = sst [smem:[#allocation39_spill]] %s4290_s23  ;;  %s4784_s17 = sld [smem:[#allocation28_spill]] }
  0x61   : > { %4783 = sst [smem:[#allocation40_spill]] %s4293_s28  ;;  %s4785_s9 = sld [smem:[#allocation29_spill]] }
  0x62   : > { %s4298_s2 = scalar_lea.vmem %s4770_s19, %s3640_s15  ;;  %s4787_s10 = sld [smem:[#allocation30_spill]] }
  0x63   : > { %4786 = sst [smem:[#allocation41_spill]] %s4298_s2  ;;  %s4788_s21 = sld [smem:[#allocation31_spill]] }
  0x64   : > { %s3643_s1 = sshll.u32 %s4280_s0, 3  ;;  %s4789_s18 = sld [smem:[#allocation32_spill]] }
  0x65   : > { %s4304_s3 = scalar_lea.vmem %s4772_s30, %s3643_s1  ;;  %s4791_s28 = sld [smem:[#allocation33_spill]] }
  0x66   : > { %4790 = sst [smem:[#allocation42_spill]] %s4304_s3  ;;  %s4313_s14 = scalar_lea.vmem %s4776_s27, %s3640_s15 }
  0x67   : > { %4792 = sst [smem:[#allocation43_spill]] %s4313_s14  ;;  %s1330_s19 = scalar_lea.vmem %s4191_s4, %s4280_s0 }
  0x68   : > { %s4318_s2 = scalar_lea.vmem %s4777_s7, %s3640_s15  ;;  %s1338_s23 = scalar_lea.vmem %s4778_s11, %s4280_s0 }
  0x69   : > { %s4323_s25 = scalar_lea.vmem %s4779_s16, %s3640_s15  ;;  %s1346_s24 = scalar_lea.vmem %s4780_s22, %s4280_s0 }
  0x6a   : > { %s4328_s30 = scalar_lea.vmem %s4782_s26, %s3643_s1  ;;  %s1354_s3 = scalar_lea.vmem %s4784_s17, %s4280_s0 }
  0x6b   : > { %s1357_s6 = scalar_lea.vmem %s4785_s9, %s4280_s0  ;;  %s1360_s29 = scalar_lea.vmem %s4787_s10, %s4280_s0 }
  0x6c   : > { %s4337_s8 = scalar_lea.vmem %s4788_s21, %s3640_s15  ;;  %s1368_s12 = scalar_lea.vmem %s4789_s18, %s4280_s0 }
  0x6d   : > { %s3649_s13 = sshll.u32 %s4280_s0, 5  ;;  %s1376_s20 = scalar_lea.vmem %s4251_s5, %s4280_s0 }
  0x6e   : > { %s4345_s27 = scalar_lea.vmem %s4791_s28, %s3649_s13  ;;  %s4793_s14 = sld [smem:[#allocation38_spill]] }
  0x74   : > { %p3566_p4 = scmp.ne.s32.totalorder %s4793_s14, 0 }
  0x75   : > { %s4794_s7 = sld [smem:[#allocation6_spill]] (!%p3566_p4)  ;;  %vm1384_vm0 = vcmask (!%p3566_p4), 261120  }
  0x76   : > { %1381 = sbr.rel (%p3566_p4) target bundleno = 125 (0x7d), region = 152 }
  0x7b   : > { %v1382_v0 = vld [vmem:[%s4794_s7] sm:$0xff] (!%p3566_p4)  ;;  %v1383_v1 = vld [vmem:[%s4794_s7 + $0x8] sm:$0xff] (!%p3566_p4) }
  0x7c   : > { %1385 = vst.msk [vmem:[#allocation2] sm:$0xff] (!%p3566_p4), %vm1384_vm0, %v1382_v0  ;;  %1386 = vst.msk [vmem:[#allocation2 + $0x8] sm:$0xff] (!%p3566_p4), %vm1384_vm0, %v1383_v1 }
  0x7d PF: > { %vm1438_vm1 = vcmask 261120   ;;  %s4795_s9 = sld [smem:[#allocation39_spill]]  ;;  %s4796_s13 = sld [smem:[#allocation40_spill]]  ;;  %v4091_v18 = vmov 0.0   ;;  %vm4092_vm2 = vmmov 0   ;;  %v4093_v42 = vmov 0  }
  0x7e   : > { %3712 = vmatprep.subr.bf16.mxu0 %v4091_v18  ;;  %3720 = vmatprep.subr.bf16.mxu1 %v4091_v18  ;;  %s4797_s17 = sld [smem:[#allocation10_spill]]  ;;  %s4798_s21 = sld [smem:[#allocation11_spill]]  ;;  %vm1687_vm3 = vcmask 64512   ;;  %vm1809_vm4 = vcmask 1043456   ;;  %vm2150_vm10 = vcmask 130048   ;;  %vm3111_vm13 = vcmask 523264  }
  0x7f   : > { %3716 = vmatprep.mubr.msk.bf16.mxu0 %vm4092_vm2, %v4091_v18  ;;  %3724 = vmatprep.mubr.msk.bf16.mxu1 %vm4092_vm2, %v4091_v18  ;;  %s4799_s14 = sld [smem:[#allocation41_spill]]  ;;  %s4803_s11 = sld [smem:[#allocation15_spill]] }
  0x80   : > { %s4802_s10 = sld [smem:[#allocation9_spill]]  ;;  %3941 = vset.pattern.permute.xlu0 %v4093_v42  ;;  %3942 = vset.pattern.permute.xlu1 %v4093_v42  ;;  %s4804_s15 = sld [smem:[#allocation13_spill]] }
  0x81   : > { %s4806_s18 = sld [smem:[#allocation17_spill]] }
  0x83   : > { %v1387_v2 = vld [vmem:[#allocation2] sm:$0xff]  ;;  %v1388_v3 = vld [vmem:[#allocation2 + $0x8] sm:$0xff] }
  0x84   : > { %v1439_v4 = vsel %vm1438_vm1, %v1387_v2, 0.0  ;;  %v1442_v5 = vsel %vm1438_vm1, %v1388_v3, 0.0  ;;  %v3953_v16 = vld [vmem:[%s4795_s9] sm:$0xff]   ;;  %v3955_v19 = vld [vmem:[%s4795_s9 + $0x8] sm:$0xff]   ;;  %s4800_s28 = scalar_lea.vmem %s4797_s17, %s4280_s0  ;;  %s4801_s1 = scalar_lea.vmem %s4798_s21, %s4280_s0 }
  0x85   : > { %1440 = vadd.xlane.f32.xlu0 %v1439_v4  ;;  %v3954_v17 = vld [vmem:[%s4796_s13] sm:$0xff]   ;;  %3713 = vmatpush3.bf16.msra.mxu0 %v3953_v16  ;;  %v3956_v20 = vld [vmem:[%s4796_s13 + $0x8] sm:$0xff]   ;;  %s4805_s16 = scalar_lea.vmem %s4803_s11, %s4280_s0  ;;  %s4094_s9 = smov 120  }
  0x86   : > { %3721 = vmatpush3.bf16.msra.mxu1 %v3954_v17  ;;  %3714 = vmatprep.subr.bf16.mxu0 %v4091_v18  ;;  %v3571_v27 = vld [vmem:[%s4800_s28] ss:$0 sm:$0xff]  ;;  %v3958_v39 = vld [vmem:[%s4799_s14 + $0x8] sm:$0xff]   ;;  %v3568_v41 = vld [vmem:[%s4802_s10 + $0x1] ss:$0 sm:$0xff]  ;;  %s4807_s22 = scalar_lea.vmem %s4804_s15, %s4280_s0  ;;  %s4813_s13 = sld [smem:[#allocation42_spill]] }
  0x87   : > { %3722 = vmatprep.subr.bf16.mxu1 %v4091_v18  ;;  %v3572_v33 = vld [vmem:[%s4801_s1] ss:$0 sm:$0xff]  ;;  %s4808_s26 = scalar_lea.vmem %s4806_s18, %s4280_s0  ;;  %s4814_s17 = sld [smem:[#allocation19_spill]] }
  0x88   : > { %v3957_v37 = vld [vmem:[%s4799_s14] sm:$0xff]   ;;  %s4095_s21 = smov 8   ;;  %s4815_s14 = sld [smem:[#allocation8_spill]] }
  0x89   : > { %1443 = vadd.xlane.f32.xlu0 %v1442_v5  ;;  %3715 = vmatpush3.bf16.msra.mxu0 %v3955_v19  ;;  %v3567_v40 = vld [vmem:[%s4802_s10] ss:$0 sm:$0xff]  ;;  %s4817_s1 = sld [smem:[#allocation7_spill]]  ;;  %s4818_s11 = sld [smem:[#allocation43_spill]] }
  0x8a   : > { %3723 = vmatpush3.bf16.msra.mxu1 %v3956_v20  ;;  %3728 = vmatprep.subr.bf16.mxu0 %v4091_v18  ;;  %v3577_v43 = vld [vmem:[%s4805_s16] ss:$0 sm:$0xff]  ;;  %s4819_s15 = sld [smem:[#allocation20_spill]] }
  0x8b   : > { %3736 = vmatprep.subr.bf16.mxu1 %v4091_v18  ;;  %v3573_v55 = vld [vmem:[%s4807_s22] ss:$0 sm:$0xff] }
  0x8c   : > { %v3581_v58 = vld [vmem:[%s4808_s26] ss:$0 sm:$0xff] }
  0x8d   : > { %s4816_s28 = scalar_lea.vmem %s4814_s17, %s4280_s0 }
  0x90   : > { %s4821_s16 = scalar_lea.vmem %s4819_s15, %s4280_s0 }
  0x9f   : > { %1409 = vperm.xlu0 %3941, %v3567_v40  }
 0x112   : > { %v1441_v6 = vpop.xlane.xlu0 %1440 }
 0x113   : > { %v1446_v7 = vmul.f32 0.03125, %v1441_v6 }
 0x115   : > { %v1448_v8 = vsub.f32 %v1387_v2, %v1446_v7 }
 0x116   : > { %v1444_v9 = vpop.xlane.xlu0 %1443 }
 0x117   : > { %v1447_v10 = vmul.f32 0.03125, %v1444_v9  ;;  %v1450_v11 = vmul.f32 %v1448_v8, %v1448_v8  ;;  %v1466_v29 = vmul.f32 %v3571_v27, %v1448_v8 }
 0x119   : > { %v1449_v12 = vsub.f32 %v1388_v3, %v1447_v10  ;;  %v1452_v13 = vsel %vm1438_vm1, %v1450_v11, 0.0  ;;  %v1391_v10 = vlaneseq }
 0x11a   : > { %1453 = vadd.xlane.f32.xlu1 %v1452_v13 }
 0x11b   : > { %v1451_v14 = vmul.f32 %v1449_v12, %v1449_v12  ;;  %v1467_v30 = vmul.f32 %v3571_v27, %v1449_v12  ;;  %v4424_v11 = vand.u32 127, %v1391_v10  ;;  %v1394_v12 = vshrl.u32 %v1391_v10, 7 }
 0x11d   : > { %v1455_v15 = vsel %vm1438_vm1, %v1451_v14, 0.0  ;;  %vm1399_vm6 = vcmp.le.s32.totalorder %v4424_v11, %v1394_v12 }
 0x11e   : > { %1456 = vadd.xlane.f32.xlu1 %v1455_v15  ;;  %v1410_v13 = vpop.permute.xlu0 %1409 }
 0x11f   : > { %vm1414_vm5 = vcmp.lt.s32.totalorder %v4424_v11, %v1410_v13 }
 0x120   : > { %vm4429_vm8 = vmand %vm1399_vm6, %vm1414_vm5 }
 0x12f   : > { %1412 = vperm.xlu1 %3942, %v3568_v41  }
 0x1a7   : > { %v1454_v21 = vpop.xlane.xlu1 %1453 }
 0x1a8   : > { %v1458_v22 = vmul.f32 0.03125, %v1454_v21 }
 0x1aa   : > { %v1468_v23 = vadd.f32 1e-06, %v1458_v22 }
 0x1ab   : > { %v1457_v24 = vpop.xlane.xlu1 %1456 }
 0x1ac   : > { %3973 = vrsqrt.f32 %v1468_v23  ;;  %v1459_v25 = vmul.f32 0.03125, %v1457_v24 }
 0x1ae   : > { %v1469_v26 = vadd.f32 1e-06, %v1459_v25 }
 0x1af   : > { %v1413_v14 = vpop.permute.xlu1 %1412 }
 0x1b0   : > { %3975 = vrsqrt.f32 %v1469_v26  ;;  %vm1415_vm7 = vcmp.lt.s32.totalorder %v4424_v11, %v1413_v14 }
 0x1b1   : > { %vm4433_vm9 = vmand %vm1399_vm6, %vm1415_vm7 }
 0x1b6   : > { %v3974_v28 = vpop.eup %3973 }
 0x1b7   : > { %v1472_v31 = vmul.f32 %v3974_v28, %v1466_v29 }
 0x1b9   : > { %v4374_v35 = vadd.f32 %v3572_v33, %v1472_v31 }
 0x1ba   : > { %v3976_v32 = vpop.eup %3975 }
 0x1bb   : > { %v1473_v34 = vmul.f32 %v3976_v32, %v1467_v30 }
 0x1bd   : > { %v4376_v36 = vadd.f32 %v3572_v33, %v1473_v34 }
 0x1bf   : > { %v1500_v38 = vpack.c.bf16 %v4376_v36, %v4374_v35 }
 0x1c1   : > { %3717 = vmatmul.mubr.msk.bf16.vlgmr.msra.gmra.mrb[0].mxu0 %vm1438_vm1, %v1500_v38  ;;  %3725 = vmatmul.mubr.msk.bf16.vlgmr.msra.gmra.mrb[0].mxu1 %vm1438_vm1, %v1500_v38 }
 0x1c2   : > { %3729 = vmatpush3.bf16.msra.mxu0 %v3957_v37  ;;  %3732 = vmatprep.mubr.msk.bf16.mxu0 %vm4092_vm2, %v4091_v18 }
 0x1c3   : > { %3730 = vmatprep.subr.bf16.mxu0 %v4091_v18  ;;  %3738 = vmatprep.mubr.msk.bf16.mxu1 %vm4092_vm2, %v4091_v18 }
 0x1c6   : > { %3731 = vmatpush3.bf16.msra.mxu0 %v3958_v39 }
 0x1c7   : > { %3742 = vmatprep.subr.bf16.mxu0 %v4091_v18 }
 0x1c9   : > { %3733 = vmatmul.mubr.msk.bf16.vlgmr.msra.gmra.mrb[4].mxu0 %vm1438_vm1, %v1500_v38 }
 0x1ca   : > { %3744 = vmatprep.mubr.msk.bf16.mxu0 %vm4092_vm2, %v4091_v18 }
 0x294   : > { %v1556_v44 = vpop.f32.mrb[0].mxu0  ;;  %v1615_v45 = vpop.f32.mrb[0].mxu1 }
 0x295   : > { %v1616_v46 = vadd.f32 %v3577_v43, %v1615_v45  ;;  %v3718_v47 = vpop.f32.mrb[1].mxu0  ;;  %v3726_v48 = vpop.f32.mrb[1].mxu1  ;;  %v1557_v59 = vadd.f32 %v3573_v55, %v1556_v44 }
 0x296   : > { %v1559_v49 = vpop.f32.mrb[2].mxu0  ;;  %v1618_v50 = vpop.f32.mrb[2].mxu1 }
 0x297   : > { %v1683_v51 = vpack.c.bf16 %v1616_v46, %v1616_v46  ;;  %v1619_v52 = vadd.f32 %v3577_v43, %v1618_v50  ;;  %v3719_v53 = vpop.f32.mrb[3].mxu0  ;;  %v3727_v54 = vpop.f32.mrb[3].mxu1  ;;  %v1560_v62 = vadd.f32 %v3573_v55, %v1559_v49  ;;  %v1681_v2 = vpack.c.bf16 %v1557_v59, %v1557_v59 }
 0x299   : > { %v1692_v56 = vsel %vm1687_vm3, %v1683_v51, 0  ;;  %v1684_v57 = vpack.c.bf16 %v1619_v52, %v1619_v52  ;;  %v1682_v6 = vpack.c.bf16 %v1560_v62, %v1560_v62 }
 0x29a   : > { %3737 = vmatpush3.bf16.xpose.msra.mxu1 %v1692_v56 }
 0x29b   : > { %v1738_v60 = vsel %vm1687_vm3, %v1684_v57, 0  ;;  %3748 = vmatprep.subr.bf16.mxu1 %v4091_v18 }
 0x29c   : > { %v1674_v61 = vpop.f32.mrb[4].mxu0  ;;  %3743 = vmatpush3.bf16.xpose.msra.mxu0 %v1738_v60 }
 0x29d   : > { %v1675_v63 = vadd.f32 %v3581_v58, %v1674_v61  ;;  %v3734_v0 = vpop.f32.mrb[5].mxu0  ;;  %3754 = vmatprep.subr.bf16.mxu0 %v4091_v18 }
 0x29e   : > { %v1677_v1 = vpop.f32.mrb[6].mxu0 }
 0x29f   : > { %v4408_v3 = vpack.c.bf16 %v1675_v63, %v1675_v63  ;;  %v1678_v4 = vadd.f32 %v3581_v58, %v1677_v1  ;;  %v3735_v5 = vpop.f32.mrb[7].mxu0 }
 0x2a1   : > { %v1811_v7 = vsel %vm1809_vm4, %v4408_v3, 0  ;;  %v4412_v8 = vpack.c.bf16 %v1678_v4, %v1678_v4  ;;  %3739 = vmatmul.mubr.msk.bf16.vlgmr.msra.gmra.mrb[4].mxu1 %vm1687_vm3, %v1681_v2 }
 0x2a2   : > { %3749 = vmatpush3.bf16.msra.mxu1 %v1811_v7  ;;  %3750 = vmatprep.mubr.msk.bf16.mxu1 %vm4092_vm2, %v4091_v18 }
 0x2a3   : > { %v1857_v9 = vsel %vm1809_vm4, %v4412_v8, 0  ;;  %3745 = vmatmul.mubr.msk.bf16.vlgmr.msra.gmra.mrb[8].mxu0 %vm1687_vm3, %v1682_v6  ;;  %3760 = vmatprep.subr.bf16.mxu1 %v4091_v18 }
 0x2a4   : > { %3755 = vmatpush3.bf16.msra.mxu0 %v1857_v9  ;;  %3756 = vmatprep.mubr.msk.bf16.mxu0 %vm4092_vm2, %v4091_v18 }
 0x2a5   : > { %3766 = vmatprep.subr.bf16.mxu0 %v4091_v18 }
 0x374   : > { %v1728_v16 = vpop.f32.mrb[4].mxu1 }
 0x375   : > { %v1780_v19 = vsel %vm4429_vm8, %v1728_v16, -1e+09  ;;  %v3740_v20 = vpop.f32.mrb[5].mxu1 }
 0x376   : > { %v1731_v21 = vpop.f32.mrb[6].mxu1  ;;  %v1774_v22 = vpop.f32.mrb[8].mxu0  ;;  %v1782_v23 = vsel %vm1687_vm3, %v1780_v19, -inf }
 0x377   : > { %v1781_v24 = vsel %vm4433_vm9, %v1774_v22, -1e+09  ;;  %v3741_v25 = vpop.f32.mrb[7].mxu1  ;;  %v3746_v26 = vpop.f32.mrb[9].mxu0  ;;  %1783 = vmax.xlane.f32.xlu1 %v1782_v23 }
 0x378   : > { %v1777_v27 = vpop.f32.mrb[10].mxu0  ;;  %v1785_v28 = vsel %vm1687_vm3, %v1781_v24, -inf }
 0x379   : > { %v3747_v29 = vpop.f32.mrb[11].mxu0  ;;  %1786 = vmax.xlane.f32.xlu0 %v1785_v28 }
 0x388   : > { %1903 = vrot.lane.b32.xlu1 %v1683_v51, %s4094_s9 }
 0x38f   : > { %1955 = vrot.lane.b32.xlu0 %v1684_v57, %s4094_s9 }
 0x404   : > { %v1784_v30 = vpop.xlane.xlu1 %1783 }
 0x405   : > { %v1788_v31 = vsub.f32 %v1780_v19, %v1784_v30 }
 0x406   : > { %v1787_v32 = vpop.xlane.xlu0 %1786 }
 0x407   : > { %v1790_v33 = vmul.f32 1.442695, %v1788_v31  ;;  %v1789_v34 = vsub.f32 %v1781_v24, %v1787_v32 }
 0x408   : > { %v1904_v42 = vpop.permute.xlu1 %1903 }
 0x409   : > { %3977 = vpow2.f32 %v1790_v33  ;;  %v1792_v37 = vmul.f32 1.442695, %v1789_v34  ;;  %v1909_v49 = vsel %vm1687_vm3, %v1904_v42, 0 }
 0x40a   : > { %v1956_v51 = vpop.permute.xlu0 %1955 }
 0x40b   : > { %3979 = vpow2.f32 %v1792_v37  ;;  %v1961_v53 = vsel %vm1687_vm3, %v1956_v51, 0 }
 0x413   : > { %v3978_v38 = vpop.eup %3977 }
 0x414   : > { %v1794_v39 = vsel %vm1687_vm3, %v3978_v38, 0.0 }
 0x415   : > { %v3980_v40 = vpop.eup %3979  ;;  %1795 = vadd.xlane.f32.xlu1 %v1794_v39 }
 0x416   : > { %v1797_v41 = vsel %vm1687_vm3, %v3980_v40, 0.0 }
 0x419   : > { %1798 = vadd.xlane.f32.xlu1 %v1797_v41 }
 0x42a   : > { %1900 = vrot.lane.b32.xlu1 %v1681_v2, %s4094_s9 }
 0x42e   : > { %1952 = vrot.lane.b32.xlu1 %v1682_v6, %s4094_s9 }
 0x4a2   : > { %v1796_v43 = vpop.xlane.xlu1 %1795 }
 0x4a3   : > { %3981 = vrcp.f32 %v1796_v43 }
 0x4a6   : > { %v1799_v44 = vpop.xlane.xlu1 %1798 }
 0x4a7   : > { %3983 = vrcp.f32 %v1799_v44 }
 0x4aa   : > { %v1901_v54 = vpop.permute.xlu1 %1900 }
 0x4ad   : > { %v3982_v45 = vpop.eup %3981 }
 0x4ae   : > { %v1802_v46 = vmul.f32 %v3982_v45, %v3978_v38  ;;  %v1953_v55 = vpop.permute.xlu1 %1952  ;;  %v3959_v38 = vld [vmem:[%s4813_s13] sm:$0xff]  }
 0x4b0   : > { %v1804_v47 = vpack.c.bf16 %v1802_v46, %v1802_v46 }
 0x4b1   : > { %v3984_v48 = vpop.eup %3983 }
 0x4b2   : > { %v1803_v50 = vmul.f32 %v3984_v48, %v3980_v40  ;;  %3751 = vmatmul.mubr.msk.bf16.vlgmr.msra.gmra.mrb[8].mxu1 %vm1687_vm3, %v1804_v47 }
 0x4b3   : > { %3761 = vmatpush3.bf16.xpose.msra.mxu1 %v1909_v49  ;;  %3762 = vmatprep.mubr.msk.bf16.mxu1 %vm4092_vm2, %v4091_v18 }
 0x4b4   : > { %v1805_v52 = vpack.c.bf16 %v1803_v50, %v1803_v50  ;;  %3772 = vmatprep.subr.bf16.mxu1 %v4091_v18 }
 0x4b6   : > { %3757 = vmatmul.mubr.msk.bf16.vlgmr.msra.gmra.mrb[12].mxu0 %vm1687_vm3, %v1805_v52 }
 0x4b7   : > { %3767 = vmatpush3.bf16.xpose.msra.mxu0 %v1961_v53  ;;  %3768 = vmatprep.mubr.msk.bf16.mxu0 %vm4092_vm2, %v4091_v18 }
 0x4b8   : > { %3778 = vmatprep.subr.bf16.mxu0 %v4091_v18 }
 0x4ba   : > { %3763 = vmatmul.mubr.msk.bf16.vlgmr.msra.gmra.mrb[12].mxu1 %vm1687_vm3, %v1901_v54  ;;  %v3593_v54 = vld [vmem:[%s4816_s28] ss:$0 sm:$0xff] }
 0x4bb   : > { %3774 = vmatprep.mubr.msk.bf16.mxu1 %vm4092_vm2, %v4091_v18 }
 0x4be   : > { %3769 = vmatmul.mubr.msk.bf16.vlgmr.msra.gmra.mrb[16].mxu0 %vm1687_vm3, %v1953_v55 }
 0x4bf   : > { %3780 = vmatprep.mubr.msk.bf16.mxu0 %vm4092_vm2, %v4091_v18 }
 0x585   : > { %v4465_v56 = vpop.f32.mrb[8].mxu1 }
 0x586   : > { %v3752_v57 = vpop.f32.mrb[9].mxu1 }
 0x587   : > { %v1850_v58 = vpop.f32.mrb[10].mxu1 }
 0x588   : > { %v3753_v59 = vpop.f32.mrb[11].mxu1 }
 0x589   : > { %v4467_v60 = vpop.f32.mrb[12].mxu0 }
 0x58a   : > { %v3758_v61 = vpop.f32.mrb[13].mxu0 }
 0x58b   : > { %v1896_v62 = vpop.f32.mrb[14].mxu0 }
 0x58c   : > { %v3759_v63 = vpop.f32.mrb[15].mxu0 }
 0x58d   : > { %v1945_v0 = vpop.f32.mrb[12].mxu1 }
 0x58e   : > { %v2003_v1 = vsel %vm4429_vm8, %v1945_v0, -1e+09  ;;  %v3764_v2 = vpop.f32.mrb[13].mxu1 }
 0x58f   : > { %v1948_v4 = vpop.f32.mrb[14].mxu1  ;;  %v2005_v5 = vsel %vm1687_vm3, %v2003_v1, -inf }
 0x590   : > { %2006 = vmax.xlane.f32.xlu1 %v2005_v5  ;;  %v3765_v6 = vpop.f32.mrb[15].mxu1 }
 0x591   : > { %v1997_v7 = vpop.f32.mrb[16].mxu0 }
 0x592   : > { %v2004_v9 = vsel %vm4433_vm9, %v1997_v7, -1e+09  ;;  %v3770_v10 = vpop.f32.mrb[17].mxu0 }
 0x593   : > { %v2000_v12 = vpop.f32.mrb[18].mxu0  ;;  %v2008_v13 = vsel %vm1687_vm3, %v2004_v9, -inf }
 0x594   : > { %2009 = vmax.xlane.f32.xlu0 %v2008_v13  ;;  %v3771_v14 = vpop.f32.mrb[19].mxu0  ;;  %v3960_v13 = vld [vmem:[%s4318_s2] sm:$0xff]  }
 0x595   : > { %v3570_v14 = vld [vmem:[%s4815_s14 + $0x1] ss:$0 sm:$0xff] }
 0x5aa   : > { %2030 = vrot.lane.b32.xlu0 %v4408_v3, %s4094_s9 }
 0x61d   : > { %v2007_v15 = vpop.xlane.xlu1 %2006 }
 0x61e   : > { %v2011_v16 = vsub.f32 %v2003_v1, %v2007_v15  ;;  %v3569_v1 = vld [vmem:[%s4815_s14] ss:$0 sm:$0xff]  ;;  %v3961_v15 = vld [vmem:[%s4318_s2 + $0x8] sm:$0xff]   ;;  %s4820_s2 = sld [smem:[#allocation21_spill]] }
 0x620   : > { %v2013_v19 = vmul.f32 1.442695, %v2011_v16  ;;  %v1389_v16 = vld [vmem:[%s4817_s1] sm:$0xff] }
 0x621   : > { %v2010_v20 = vpop.xlane.xlu0 %2009 }
 0x622   : > { %3985 = vpow2.f32 %v2013_v19  ;;  %v2012_v21 = vsub.f32 %v2004_v9, %v2010_v20  ;;  %v1390_v19 = vld [vmem:[%s4817_s1 + $0x8] sm:$0xff] }
 0x623   : > { %v2260_v20 = vpack.c.bf16 %v1390_v19, %v1389_v16 }
 0x624   : > { %v2015_v22 = vmul.f32 1.442695, %v2012_v21  ;;  %v3962_v21 = vld [vmem:[%s4818_s11] sm:$0xff]   ;;  %s4822_s18 = scalar_lea.vmem %s4820_s2, %s4280_s0 }
 0x625   : > { %v2031_v23 = vpop.permute.xlu0 %2030 }
 0x626   : > { %3987 = vpow2.f32 %v2015_v22  ;;  %v2036_v17 = vsel %vm1809_vm4, %v2031_v23, 0  ;;  %v3963_v22 = vld [vmem:[%s4818_s11 + $0x8] sm:$0xff]  }
 0x627   : > { %3773 = vmatpush3.bf16.msra.mxu1 %v2036_v17 }
 0x628   : > { %3784 = vmatprep.subr.bf16.mxu1 %v4091_v18 }
 0x62c   : > { %v3986_v24 = vpop.eup %3985 }
 0x62d   : > { %v2017_v25 = vsel %vm1687_vm3, %v3986_v24, 0.0 }
 0x62e   : > { %2018 = vadd.xlane.f32.xlu1 %v2017_v25 }
 0x630   : > { %v3988_v26 = vpop.eup %3987 }
 0x631   : > { %v2020_v3 = vsel %vm1687_vm3, %v3988_v26, 0.0 }
 0x632   : > { %2021 = vadd.xlane.f32.xlu1 %v2020_v3 }
 0x643   : > { %2079 = vrot.lane.b32.xlu1 %v4412_v8, %s4094_s9 }
 0x6bb   : > { %v2019_v27 = vpop.xlane.xlu1 %2018 }
 0x6bc   : > { %3989 = vrcp.f32 %v2019_v27  ;;  %v3596_v27 = vld [vmem:[%s4821_s16] ss:$0 sm:$0xff] }
 0x6bf   : > { %v2022_v28 = vpop.xlane.xlu1 %2021 }
 0x6c0   : > { %3991 = vrcp.f32 %v2022_v28 }
 0x6c3   : > { %v2080_v29 = vpop.permute.xlu1 %2079 }
 0x6c4   : > { %v2085_v30 = vsel %vm1809_vm4, %v2080_v29, 0 }
 0x6c5   : > { %3779 = vmatpush3.bf16.msra.mxu0 %v2085_v30 }
 0x6c6   : > { %v3990_v31 = vpop.eup %3989  ;;  %3790 = vmatprep.subr.bf16.mxu0 %v4091_v18 }
 0x6c7   : > { %v2025_v32 = vmul.f32 %v3990_v31, %v3986_v24 }
 0x6c9   : > { %v2027_v33 = vpack.c.bf16 %v2025_v32, %v2025_v32 }
 0x6ca   : > { %v3992_v34 = vpop.eup %3991 }
 0x6cb   : > { %v2026_v37 = vmul.f32 %v3992_v34, %v3988_v26  ;;  %3775 = vmatmul.mubr.msk.bf16.vlgmr.msra.gmra.mrb[16].mxu1 %vm1687_vm3, %v2027_v33  ;;  %v3597_v33 = vld [vmem:[%s4822_s18] ss:$0 sm:$0xff] }
 0x6cc   : > { %3786 = vmatprep.mubr.msk.bf16.mxu1 %vm4092_vm2, %v4091_v18  ;;  %3785 = vmatpush3.bf16.msra.mxu1 %v3959_v38  ;;  %v3964_v38 = vld [vmem:[%s4323_s25] sm:$0xff]  }
 0x6cd   : > { %v2028_v8 = vpack.c.bf16 %v2026_v37, %v2026_v37  ;;  %3798 = vmatprep.subr.bf16.mxu1 %v4091_v18 }
 0x6cf   : > { %3781 = vmatmul.mubr.msk.bf16.vlgmr.msra.gmra.mrb[20].mxu0 %vm1687_vm3, %v2028_v8 }
 0x6d0   : > { %3794 = vmatprep.mubr.msk.bf16.mxu0 %vm4092_vm2, %v4091_v18  ;;  %3791 = vmatpush3.bf16.msra.mxu0 %v3962_v21 }
 0x6d1   : > { %3792 = vmatprep.subr.bf16.mxu0 %v4091_v18 }
 0x6d4   : > { %3793 = vmatpush3.bf16.msra.mxu0 %v3963_v22 }
 0x6d5   : > { %3806 = vmatprep.subr.bf16.mxu0 %v4091_v18 }
 0x79e   : > { %v2072_v39 = vpop.f32.mrb[16].mxu1 }
 0x79f   : > { %v3776_v40 = vpop.f32.mrb[17].mxu1 }
 0x7a0   : > { %v2075_v41 = vpop.f32.mrb[18].mxu1  ;;  %v3965_v40 = vld [vmem:[%s4323_s25 + $0x8] sm:$0xff]  }
 0x7a1   : > { %v3777_v42 = vpop.f32.mrb[19].mxu1  ;;  %v3602_v41 = vld [vmem:[%s1338_s23] ss:$0 sm:$0xff] }
 0x7a2   : > { %v2121_v43 = vpop.f32.mrb[20].mxu0 }
 0x7a3   : > { %v3943_v44 = vpack.i.bf16 %v2121_v43, %v2072_v39  ;;  %v3782_v45 = vpop.f32.mrb[21].mxu0 }
 0x7a4   : > { %v2124_v46 = vpop.f32.mrb[22].mxu0 }
 0x7a5   : > { %3944 = vrot.lane.b32.xlu1 %v3943_v44, %s4095_s21  ;;  %v3783_v47 = vpop.f32.mrb[23].mxu0 }
 0x817   : > { %v3945_v48 = vpop.permute.xlu1 %3944 }
 0x818   : > { %v3947_v49 = vunpack.i.h.bf16 %v3945_v48  ;;  %v3946_v50 = vunpack.i.l.bf16 %v3945_v48 }
 0x81a   : > { %v2136_v51 = vsel %vm1687_vm3, %v4467_v60, %v3947_v49  ;;  %v2135_v52 = vsel %vm1687_vm3, %v4465_v56, %v3946_v50 }
 0x81b   : > { %v2137_v53 = vpack.c.bf16 %v2136_v51, %v2135_v52  ;;  %v3598_v52 = vld [vmem:[%s1330_s19] ss:$0 sm:$0xff] }
 0x81d   : > { %3787 = vmatmul.mubr.msk.bf16.vlgmr.msra.gmra.mrb[20].mxu1 %vm2150_vm10, %v2137_v53 }
 0x81e   : > { %3802 = vmatprep.mubr.msk.bf16.mxu1 %vm4092_vm2, %v4091_v18  ;;  %3799 = vmatpush3.bf16.msra.mxu1 %v3960_v13 }
 0x81f   : > { %3800 = vmatprep.subr.bf16.mxu1 %v4091_v18 }
 0x822   : > { %3801 = vmatpush3.bf16.msra.mxu1 %v3961_v15 }
 0x823   : > { %3814 = vmatprep.subr.bf16.mxu1 %v4091_v18 }
 0x825   : > { %3803 = vmatmul.mubr.msk.bf16.vlgmr.msra.gmra.mrb[24].mxu1 %vm1438_vm1, %v2260_v20 }
 0x826   : > { %3816 = vmatprep.mubr.msk.bf16.mxu1 %vm4092_vm2, %v4091_v18 }
 0x8f0   : > { %v2188_v55 = vpop.f32.mrb[20].mxu1 }
 0x8f1   : > { %v2189_v57 = vadd.f32 %v3593_v54, %v2188_v55  ;;  %v3788_v58 = vpop.f32.mrb[21].mxu1 }
 0x8f2   : > { %v2191_v59 = vpop.f32.mrb[22].mxu1 }
 0x8f3   : > { %v2192_v61 = vadd.f32 %v3593_v54, %v2191_v59  ;;  %v3789_v62 = vpop.f32.mrb[23].mxu1  ;;  %v2195_v60 = vadd.f32 %v2189_v57, %v4374_v35 }
 0x8f5   : > { %v2199_v56 = vsel %vm1438_vm1, %v2195_v60, 0.0  ;;  %v2196_v63 = vadd.f32 %v2192_v61, %v4376_v36 }
 0x8f6   : > { %2200 = vadd.xlane.f32.xlu0 %v2199_v56 }
 0x8f7   : > { %v2202_v0 = vsel %vm1438_vm1, %v2196_v63, 0.0 }
 0x8f8   : > { %2203 = vadd.xlane.f32.xlu1 %v2202_v0  ;;  %v2378_v42 = vpop.f32.mrb[24].mxu1 }
 0x8f9   : > { %v2379_v43 = vadd.f32 %v3602_v41, %v2378_v42  ;;  %v3804_v44 = vpop.f32.mrb[25].mxu1 }
 0x8fa   : > { %v2381_v45 = vpop.f32.mrb[26].mxu1 }
 0x8fb   : > { %v2446_v46 = vpack.c.bf16 %v2379_v43, %v2379_v43  ;;  %v2382_v47 = vadd.f32 %v3602_v41, %v2381_v45  ;;  %v3805_v48 = vpop.f32.mrb[27].mxu1 }
 0x8fd   : > { %v2454_v49 = vsel %vm1687_vm3, %v2446_v46, 0  ;;  %v4551_v50 = vpack.c.bf16 %v2382_v47, %v2382_v47 }
 0x8fe   : > { %3815 = vmatpush3.bf16.xpose.msra.mxu1 %v2454_v49 }
 0x8ff   : > { %v2500_v51 = vsel %vm1687_vm3, %v4551_v50, 0  ;;  %3826 = vmatprep.subr.bf16.mxu1 %v4091_v18 }
 0x909   : > { %1429 = vperm.xlu1 %3942, %v3569_v1  }
 0x983   : > { %v2201_v2 = vpop.xlane.xlu0 %2200 }
 0x984   : > { %v2205_v4 = vmul.f32 0.03125, %v2201_v2 }
 0x985   : > { %v2204_v5 = vpop.xlane.xlu1 %2203 }
 0x986   : > { %v2207_v6 = vsub.f32 %v2195_v60, %v2205_v4  ;;  %v2206_v7 = vmul.f32 0.03125, %v2204_v5  ;;  %v3606_v60 = vld [vmem:[%s1346_s24] ss:$0 sm:$0xff] }
 0x988   : > { %v2208_v35 = vsub.f32 %v2196_v63, %v2206_v7  ;;  %v2209_v9 = vmul.f32 %v2207_v6, %v2207_v6  ;;  %v2225_v29 = vmul.f32 %v3596_v27, %v2207_v6 }
 0x98a   : > { %v2211_v36 = vsel %vm1438_vm1, %v2209_v9, 0.0  ;;  %v2210_v10 = vmul.f32 %v2208_v35, %v2208_v35  ;;  %v2226_v30 = vmul.f32 %v3596_v27, %v2208_v35  ;;  %v4579_v9 = vpop.permute.xlu1 %1429 }
 0x98b   : > { %2212 = vadd.xlane.f32.xlu0 %v2211_v36  ;;  %vm1434_vm11 = vcmp.lt.s32.totalorder %v4424_v11, %v4579_v9 }
 0x98c   : > { %v2214_v12 = vsel %vm1438_vm1, %v2210_v10, 0.0 }
 0x98f   : > { %2215 = vadd.xlane.f32.xlu0 %v2214_v12 }
 0x9a5   : > { %1432 = vperm.xlu0 %3941, %v3570_v14  }
 0xa18   : > { %v2213_v23 = vpop.xlane.xlu0 %2212 }
 0xa19   : > { %v2217_v17 = vmul.f32 0.03125, %v2213_v23 }
 0xa1b   : > { %v2227_v24 = vadd.f32 1e-06, %v2217_v17 }
 0xa1c   : > { %v2216_v25 = vpop.xlane.xlu0 %2215 }
 0xa1d   : > { %3993 = vrsqrt.f32 %v2227_v24  ;;  %v2218_v26 = vmul.f32 0.03125, %v2216_v25 }
 0xa1f   : > { %v2228_v3 = vadd.f32 1e-06, %v2218_v26 }
 0xa21   : > { %3995 = vrsqrt.f32 %v2228_v3 }
 0xa24   : > { %v4581_v36 = vpop.permute.xlu0 %1432 }
 0xa25   : > { %vm1435_vm12 = vcmp.lt.s32.totalorder %v4424_v11, %v4581_v36 }
 0xa27   : > { %v3994_v28 = vpop.eup %3993 }
 0xa28   : > { %v2231_v31 = vmul.f32 %v3994_v28, %v2225_v29 }
 0xa2a   : > { %v4531_v37 = vadd.f32 %v3597_v33, %v2231_v31 }
 0xa2b   : > { %v3996_v32 = vpop.eup %3995 }
 0xa2c   : > { %v2232_v34 = vmul.f32 %v3996_v32, %v2226_v30 }
 0xa2e   : > { %v4533_v8 = vadd.f32 %v3597_v33, %v2232_v34 }
 0xa30   : > { %v2259_v39 = vpack.c.bf16 %v4533_v8, %v4531_v37 }
 0xa32   : > { %3795 = vmatmul.mubr.msk.bf16.vlgmr.msra.gmra.mrb[24].mxu0 %vm1438_vm1, %v2259_v39 }
 0xa33   : > { %3807 = vmatpush3.bf16.msra.mxu0 %v3964_v38  ;;  %3810 = vmatprep.mubr.msk.bf16.mxu0 %vm4092_vm2, %v4091_v18 }
 0xa34   : > { %3808 = vmatprep.subr.bf16.mxu0 %v4091_v18 }
 0xa37   : > { %3809 = vmatpush3.bf16.msra.mxu0 %v3965_v40 }
 0xa38   : > { %3820 = vmatprep.subr.bf16.mxu0 %v4091_v18 }
 0xa3a   : > { %3811 = vmatmul.mubr.msk.bf16.vlgmr.msra.gmra.mrb[28].mxu0 %vm1438_vm1, %v2260_v20 }
 0xa3b   : > { %3822 = vmatprep.mubr.msk.bf16.mxu0 %vm4092_vm2, %v4091_v18 }
 0xa40   : > { %3821 = vmatpush3.bf16.xpose.msra.mxu0 %v2500_v51 }
 0xa41   : > { %3832 = vmatprep.subr.bf16.mxu0 %v4091_v18 }
 0xb05   : > { %v2316_v53 = vpop.f32.mrb[24].mxu0 }
 0xb06   : > { %v2317_v54 = vadd.f32 %v3598_v52, %v2316_v53  ;;  %v3796_v55 = vpop.f32.mrb[25].mxu0 }
 0xb07   : > { %v2319_v57 = vpop.f32.mrb[26].mxu0 }
 0xb08   : > { %v2444_v58 = vpack.c.bf16 %v2317_v54, %v2317_v54  ;;  %v2320_v59 = vadd.f32 %v3598_v52, %v2319_v57  ;;  %v3797_v61 = vpop.f32.mrb[27].mxu0 }
 0xb0a   : > { %v2445_v62 = vpack.c.bf16 %v2320_v59, %v2320_v59  ;;  %3817 = vmatmul.mubr.msk.bf16.vlgmr.msra.gmra.mrb[28].mxu1 %vm1687_vm3, %v2444_v58 }
 0xb0b   : > { %3828 = vmatprep.mubr.msk.bf16.mxu1 %vm4092_vm2, %v4091_v18 }
 0xb0c   : > { %3823 = vmatmul.mubr.msk.bf16.vlgmr.msra.gmra.mrb[32].mxu0 %vm1687_vm3, %v2445_v62 }
 0xb0d   : > { %v2437_v56 = vpop.f32.mrb[28].mxu0  ;;  %3834 = vmatprep.mubr.msk.bf16.mxu0 %vm4092_vm2, %v4091_v18 }
 0xb0e   : > { %v2438_v63 = vadd.f32 %v3606_v60, %v2437_v56  ;;  %v3812_v0 = vpop.f32.mrb[29].mxu0 }
 0xb0f   : > { %v2440_v1 = vpop.f32.mrb[30].mxu0 }
 0xb10   : > { %v4569_v2 = vpack.c.bf16 %v2438_v63, %v2438_v63  ;;  %v2441_v4 = vadd.f32 %v3606_v60, %v2440_v1  ;;  %v3813_v5 = vpop.f32.mrb[31].mxu0 }
 0xb12   : > { %v2572_v6 = vsel %vm1809_vm4, %v4569_v2, 0  ;;  %v4573_v7 = vpack.c.bf16 %v2441_v4, %v2441_v4 }
 0xb13   : > { %3827 = vmatpush3.bf16.msra.mxu1 %v2572_v6 }
 0xb14   : > { %v2618_v35 = vsel %vm1809_vm4, %v4573_v7, 0  ;;  %3838 = vmatprep.subr.bf16.mxu1 %v4091_v18 }
 0xb15   : > { %3833 = vmatpush3.bf16.msra.mxu0 %v2618_v35 }
 0xb16   : > { %3844 = vmatprep.subr.bf16.mxu0 %v4091_v18 }
 0xbdd   : > { %v2490_v10 = vpop.f32.mrb[28].mxu1 }
 0xbde   : > { %v2542_v12 = vsel %vm1434_vm11, %v2490_v10, -1e+09  ;;  %v3818_v13 = vpop.f32.mrb[29].mxu1 }
 0xbdf   : > { %v2493_v14 = vpop.f32.mrb[30].mxu1  ;;  %v2536_v15 = vpop.f32.mrb[32].mxu0  ;;  %v2544_v16 = vsel %vm1687_vm3, %v2542_v12, -inf }
 0xbe0   : > { %v2543_v19 = vsel %vm1435_vm12, %v2536_v15, -1e+09  ;;  %2545 = vmax.xlane.f32.xlu1 %v2544_v16  ;;  %v3819_v20 = vpop.f32.mrb[31].mxu1  ;;  %v3824_v21 = vpop.f32.mrb[33].mxu0 }
 0xbe1   : > { %v2539_v22 = vpop.f32.mrb[34].mxu0  ;;  %v2547_v23 = vsel %vm1687_vm3, %v2543_v19, -inf }
 0xbe2   : > { %2548 = vmax.xlane.f32.xlu0 %v2547_v23  ;;  %v3825_v17 = vpop.f32.mrb[35].mxu0 }
 0xbf1   : > { %2664 = vrot.lane.b32.xlu1 %v2446_v46, %s4094_s9 }
 0xc6d   : > { %v2546_v24 = vpop.xlane.xlu1 %2545 }
 0xc6e   : > { %v2550_v25 = vsub.f32 %v2542_v12, %v2546_v24 }
 0xc6f   : > { %v2549_v26 = vpop.xlane.xlu0 %2548 }
 0xc70   : > { %v2552_v3 = vmul.f32 1.442695, %v2550_v25  ;;  %v2551_v27 = vsub.f32 %v2543_v19, %v2549_v26 }
 0xc71   : > { %v2665_v33 = vpop.permute.xlu1 %2664 }
 0xc72   : > { %3997 = vpow2.f32 %v2552_v3  ;;  %v2554_v28 = vmul.f32 1.442695, %v2551_v27  ;;  %v2670_v45 = vsel %vm1687_vm3, %v2665_v33, 0 }
 0xc74   : > { %3999 = vpow2.f32 %v2554_v28  ;;  %v3966_v28 = vld [vmem:[%s4328_s30] sm:$0xff]  }
 0xc7c   : > { %v3998_v29 = vpop.eup %3997 }
 0xc7d   : > { %v2556_v30 = vsel %vm1687_vm3, %v3998_v29, 0.0 }
 0xc7e   : > { %v4000_v31 = vpop.eup %3999  ;;  %2557 = vadd.xlane.f32.xlu1 %v2556_v30 }
 0xc7f   : > { %v2559_v32 = vsel %vm1687_vm3, %v4000_v31, 0.0 }
 0xc80   : > { %2560 = vadd.xlane.f32.xlu0 %v2559_v32 }
 0xc8f   : > { %2661 = vrot.lane.b32.xlu1 %v2444_v58, %s4094_s9 }
 0xc93   : > { %2713 = vrot.lane.b32.xlu1 %v2445_v62, %s4094_s9 }
 0xc96   : > { %2716 = vrot.lane.b32.xlu0 %v4551_v50, %s4094_s9 }
 0xd0b   : > { %v2558_v34 = vpop.xlane.xlu1 %2557 }
 0xd0c   : > { %4001 = vrcp.f32 %v2558_v34 }
 0xd0d   : > { %v2561_v38 = vpop.xlane.xlu0 %2560 }
 0xd0e   : > { %4003 = vrcp.f32 %v2561_v38 }
 0xd0f   : > { %v2662_v48 = vpop.permute.xlu1 %2661 }
 0xd11   : > { %v2717_v44 = vpop.permute.xlu0 %2716 }
 0xd12   : > { %v2722_v47 = vsel %vm1687_vm3, %v2717_v44, 0 }
 0xd13   : > { %v2714_v49 = vpop.permute.xlu1 %2713 }
 0xd16   : > { %v4002_v39 = vpop.eup %4001 }
 0xd17   : > { %v2564_v40 = vmul.f32 %v4002_v39, %v3998_v29 }
 0xd18   : > { %v4004_v41 = vpop.eup %4003 }
 0xd19   : > { %v2565_v42 = vmul.f32 %v4004_v41, %v4000_v31  ;;  %v2566_v43 = vpack.c.bf16 %v2564_v40, %v2564_v40 }
 0xd1b   : > { %3829 = vmatmul.mubr.msk.bf16.vlgmr.msra.gmra.mrb[32].mxu1 %vm1687_vm3, %v2566_v43  ;;  %v2567_v46 = vpack.c.bf16 %v2565_v42, %v2565_v42 }
 0xd1c   : > { %3839 = vmatpush3.bf16.xpose.msra.mxu1 %v2670_v45  ;;  %3840 = vmatprep.mubr.msk.bf16.mxu1 %vm4092_vm2, %v4091_v18 }
 0xd1d   : > { %3835 = vmatmul.mubr.msk.bf16.vlgmr.msra.gmra.mrb[36].mxu0 %vm1687_vm3, %v2567_v46  ;;  %3850 = vmatprep.subr.bf16.mxu1 %v4091_v18 }
 0xd1e   : > { %3845 = vmatpush3.bf16.xpose.msra.mxu0 %v2722_v47  ;;  %3846 = vmatprep.mubr.msk.bf16.mxu0 %vm4092_vm2, %v4091_v18  ;;  %v3618_v47 = vld [vmem:[%s1354_s3] ss:$0 sm:$0xff] }
 0xd1f   : > { %3856 = vmatprep.subr.bf16.mxu0 %v4091_v18 }
 0xd23   : > { %3841 = vmatmul.mubr.msk.bf16.vlgmr.msra.gmra.mrb[36].mxu1 %vm1687_vm3, %v2662_v48 }
 0xd24   : > { %3852 = vmatprep.mubr.msk.bf16.mxu1 %vm4092_vm2, %v4091_v18 }
 0xd25   : > { %3847 = vmatmul.mubr.msk.bf16.vlgmr.msra.gmra.mrb[40].mxu0 %vm1687_vm3, %v2714_v49 }
 0xd26   : > { %3858 = vmatprep.mubr.msk.bf16.mxu0 %vm4092_vm2, %v4091_v18 }
 0xdee   : > { %v4618_v50 = vpop.f32.mrb[32].mxu1 }
 0xdef   : > { %v3830_v51 = vpop.f32.mrb[33].mxu1 }
 0xdf0   : > { %v2611_v52 = vpop.f32.mrb[34].mxu1  ;;  %v4620_v53 = vpop.f32.mrb[36].mxu0 }
 0xdf1   : > { %v3831_v54 = vpop.f32.mrb[35].mxu1  ;;  %v3836_v55 = vpop.f32.mrb[37].mxu0 }
 0xdf2   : > { %v2657_v57 = vpop.f32.mrb[38].mxu0 }
 0xdf3   : > { %v3837_v58 = vpop.f32.mrb[39].mxu0 }
 0xdf6   : > { %v2706_v59 = vpop.f32.mrb[36].mxu1 }
 0xdf7   : > { %v2764_v61 = vsel %vm1434_vm11, %v2706_v59, -1e+09  ;;  %v3842_v62 = vpop.f32.mrb[37].mxu1 }
 0xdf8   : > { %v2709_v60 = vpop.f32.mrb[38].mxu1  ;;  %v2758_v56 = vpop.f32.mrb[40].mxu0  ;;  %v2766_v63 = vsel %vm1687_vm3, %v2764_v61, -inf }
 0xdf9   : > { %v2765_v0 = vsel %vm1435_vm12, %v2758_v56, -1e+09  ;;  %v3843_v1 = vpop.f32.mrb[39].mxu1  ;;  %2767 = vmax.xlane.f32.xlu0 %v2766_v63  ;;  %v3848_v4 = vpop.f32.mrb[41].mxu0 }
 0xdfa   : > { %v2761_v5 = vpop.f32.mrb[42].mxu0  ;;  %v2769_v6 = vsel %vm1687_vm3, %v2765_v0, -inf  ;;  %v3967_v4 = vld [vmem:[%s4337_s8] sm:$0xff]  }
 0xdfb   : > { %2770 = vmax.xlane.f32.xlu1 %v2769_v6  ;;  %v3849_v35 = vpop.f32.mrb[43].mxu0  ;;  %v3968_v5 = vld [vmem:[%s4337_s8 + $0x8] sm:$0xff]   ;;  %v3969_v6 = vld [vmem:[%s4345_s27] sm:$0xff]  }
 0xdfc   : > { %v3970_v35 = vld [vmem:[%s4345_s27 + $0x8] sm:$0xff]  }
 0xe0c   : > { %2791 = vrot.lane.b32.xlu1 %v4569_v2, %s4094_s9 }
 0xe86   : > { %v2768_v9 = vpop.xlane.xlu0 %2767 }
 0xe87   : > { %v2772_v10 = vsub.f32 %v2764_v61, %v2768_v9 }
 0xe88   : > { %v2771_v12 = vpop.xlane.xlu1 %2770 }
 0xe89   : > { %v2774_v13 = vmul.f32 1.442695, %v2772_v10  ;;  %v2773_v14 = vsub.f32 %v2765_v0, %v2771_v12 }
 0xe8b   : > { %4005 = vpow2.f32 %v2774_v13  ;;  %v2776_v15 = vmul.f32 1.442695, %v2773_v14 }
 0xe8c   : > { %v2792_v11 = vpop.permute.xlu1 %2791 }
 0xe8d   : > { %4007 = vpow2.f32 %v2776_v15  ;;  %v2797_v36 = vsel %vm1809_vm4, %v2792_v11, 0  ;;  %v3621_v11 = vld [vmem:[%s1357_s6] ss:$0 sm:$0xff] }
 0xe8e   : > { %3851 = vmatpush3.bf16.msra.mxu1 %v2797_v36 }
 0xe8f   : > { %3862 = vmatprep.subr.bf16.mxu1 %v4091_v18 }
 0xe95   : > { %v4006_v16 = vpop.eup %4005 }
 0xe96   : > { %v2778_v19 = vsel %vm1687_vm3, %v4006_v16, 0.0 }
 0xe97   : > { %v4008_v20 = vpop.eup %4007  ;;  %2779 = vadd.xlane.f32.xlu0 %v2778_v19 }
 0xe98   : > { %v2781_v2 = vsel %vm1687_vm3, %v4008_v20, 0.0 }
 0xe9b   : > { %2782 = vadd.xlane.f32.xlu0 %v2781_v2 }
 0xeb1   : > { %2840 = vrot.lane.b32.xlu0 %v4573_v7, %s4094_s9 }
 0xf24   : > { %v2780_v21 = vpop.xlane.xlu0 %2779 }
 0xf25   : > { %4009 = vrcp.f32 %v2780_v21  ;;  %v3622_v21 = vld [vmem:[%s1360_s29] ss:$0 sm:$0xff]  ;;  %s4829_s29 = sld [smem:[#allocation38_spill]] }
 0xf28   : > { %v2783_v22 = vpop.xlane.xlu0 %2782 }
 0xf29   : > { %4011 = vrcp.f32 %v2783_v22 }
 0xf2b   : > { %p3633_p5 = scmp.ne.s32.totalorder %s4829_s29, 1 }
 0xf2c   : > { %v2841_v23 = vpop.permute.xlu0 %2840  ;;  %s4830_s30 = sld [smem:[#allocation34_spill]] (!%p3633_p5)  ;;  %s4831_s6 = sld [smem:[#allocation35_spill]] (!%p3633_p5) }
 0xf2d   : > { %v2846_v17 = vsel %vm1809_vm4, %v2841_v23, 0 }
 0xf2e   : > { %3857 = vmatpush3.bf16.msra.mxu0 %v2846_v17 }
 0xf2f   : > { %v4010_v24 = vpop.eup %4009  ;;  %3868 = vmatprep.subr.bf16.mxu0 %v4091_v18 }
 0xf30   : > { %v2786_v25 = vmul.f32 %v4010_v24, %v4006_v16 }
 0xf32   : > { %v2788_v26 = vpack.c.bf16 %v2786_v25, %v2786_v25  ;;  %v3971_v25 = vld [vmem:[%s4345_s27 + $0x10] sm:$0xff]  }
 0xf33   : > { %v4012_v3 = vpop.eup %4011 }
 0xf34   : > { %v2787_v27 = vmul.f32 %v4012_v3, %v4008_v20  ;;  %3853 = vmatmul.mubr.msk.bf16.vlgmr.msra.gmra.mrb[40].mxu1 %vm1687_vm3, %v2788_v26  ;;  %v3972_v26 = vld [vmem:[%s4345_s27 + $0x18] sm:$0xff]   ;;  %v3623_v3 = vld [vmem:[%s1368_s12] ss:$0 sm:$0xff] }
 0xf35   : > { %3864 = vmatprep.mubr.msk.bf16.mxu1 %vm4092_vm2, %v4091_v18  ;;  %3863 = vmatpush3.bf16.msra.mxu1 %v3966_v28 }
 0xf36   : > { %v2789_v7 = vpack.c.bf16 %v2787_v27, %v2787_v27  ;;  %3876 = vmatprep.subr.bf16.mxu1 %v4091_v18 }
 0xf38   : > { %3859 = vmatmul.mubr.msk.bf16.vlgmr.msra.gmra.mrb[44].mxu0 %vm1687_vm3, %v2789_v7 }
 0xf39   : > { %3872 = vmatprep.mubr.msk.bf16.mxu0 %vm4092_vm2, %v4091_v18  ;;  %3869 = vmatpush3.bf16.msra.mxu0 %v3967_v4 }
 0xf3a   : > { %3870 = vmatprep.subr.bf16.mxu0 %v4091_v18 }
 0xf3d   : > { %3871 = vmatpush3.bf16.msra.mxu0 %v3968_v5 }
0x1007   : > { %v2833_v29 = vpop.f32.mrb[40].mxu1 }
0x1008   : > { %v3854_v30 = vpop.f32.mrb[41].mxu1 }
0x1009   : > { %v2836_v31 = vpop.f32.mrb[42].mxu1 }
0x100a   : > { %v3855_v32 = vpop.f32.mrb[43].mxu1 }
0x100b   : > { %v2882_v33 = vpop.f32.mrb[44].mxu0 }
0x100c   : > { %v3948_v34 = vpack.i.bf16 %v2882_v33, %v2833_v29  ;;  %v3860_v38 = vpop.f32.mrb[45].mxu0 }
0x100d   : > { %v2885_v39 = vpop.f32.mrb[46].mxu0  ;;  %v3627_v38 = vld [vmem:[%s1376_s20] ss:$0 sm:$0xff] }
0x100e   : > { %3949 = vrot.lane.b32.xlu1 %v3948_v34, %s4095_s21  ;;  %v3861_v40 = vpop.f32.mrb[47].mxu0 }
0x1080   : > { %v3950_v41 = vpop.permute.xlu1 %3949 }
0x1081   : > { %v3952_v42 = vunpack.i.h.bf16 %v3950_v41  ;;  %v3951_v43 = vunpack.i.l.bf16 %v3950_v41 }
0x1083   : > { %v2897_v44 = vsel %vm1687_vm3, %v4620_v53, %v3952_v42  ;;  %v2896_v45 = vsel %vm1687_vm3, %v4618_v50, %v3951_v43 }
0x1084   : > { %v2898_v46 = vpack.c.bf16 %v2897_v44, %v2896_v45 }
0x1086   : > { %3865 = vmatmul.mubr.msk.bf16.vlgmr.msra.gmra.mrb[44].mxu1 %vm2150_vm10, %v2898_v46 }
0x1087   : > { %3884 = vmatprep.mubr.msk.bf16.mxu1 %vm4092_vm2, %v4091_v18  ;;  %3877 = vmatpush3.bf16.msra.mxu1 %v3969_v6 }
0x1088   : > { %3878 = vmatprep.subr.bf16.mxu1 %v4091_v18 }
0x108b   : > { %3879 = vmatpush3.bf16.msra.mxu1 %v3970_v35 }
0x108c   : > { %3880 = vmatprep.subr.bf16.mxu1 %v4091_v18 }
0x108f   : > { %3881 = vmatpush3.bf16.msra.mxu1 %v3971_v25 }
0x1090   : > { %3882 = vmatprep.subr.bf16.mxu1 %v4091_v18 }
0x1093   : > { %3883 = vmatpush3.bf16.msra.mxu1 %v3972_v26 }
0x1159   : > { %v2948_v48 = vpop.f32.mrb[44].mxu1 }
0x115a   : > { %v2949_v49 = vadd.f32 %v3618_v47, %v2948_v48  ;;  %v3866_v51 = vpop.f32.mrb[45].mxu1 }
0x115b   : > { %v2951_v52 = vpop.f32.mrb[46].mxu1 }
0x115c   : > { %v2952_v54 = vadd.f32 %v3618_v47, %v2951_v52  ;;  %v3867_v55 = vpop.f32.mrb[47].mxu1  ;;  %v2955_v57 = vadd.f32 %v2949_v49, %v4531_v37 }
0x115e   : > { %v2959_v53 = vsel %vm1438_vm1, %v2955_v57, 0.0  ;;  %v2956_v50 = vadd.f32 %v2952_v54, %v4533_v8 }
0x115f   : > { %2960 = vadd.xlane.f32.xlu1 %v2959_v53 }
0x1160   : > { %v2962_v58 = vsel %vm1438_vm1, %v2956_v50, 0.0 }
0x1161   : > { %2963 = vadd.xlane.f32.xlu0 %v2962_v58 }
0x11ec   : > { %v2961_v59 = vpop.xlane.xlu1 %2960 }
0x11ed   : > { %v2965_v61 = vmul.f32 0.03125, %v2961_v59 }
0x11ee   : > { %v2964_v62 = vpop.xlane.xlu0 %2963 }
0x11ef   : > { %v2967_v60 = vsub.f32 %v2955_v57, %v2965_v61  ;;  %v2966_v56 = vmul.f32 0.03125, %v2964_v62 }
0x11f1   : > { %v2968_v63 = vsub.f32 %v2956_v50, %v2966_v56  ;;  %v2969_v0 = vmul.f32 %v2967_v60, %v2967_v60  ;;  %v2985_v36 = vmul.f32 %v3621_v11, %v2967_v60 }
0x11f3   : > { %v2971_v37 = vsel %vm1438_vm1, %v2969_v0, 0.0  ;;  %v2970_v1 = vmul.f32 %v2968_v63, %v2968_v63  ;;  %v2986_v19 = vmul.f32 %v3621_v11, %v2968_v63  ;;  %v3634_v0 = vld [vmem:[%s4830_s30] ss:$0 sm:$0xff] (!%p3633_p5) }
0x11f4   : > { %2972 = vadd.xlane.f32.xlu0 %v2971_v37 }
0x11f5   : > { %v2974_v8 = vsel %vm1438_vm1, %v2970_v1, 0.0 }
0x11f6   : > { %2975 = vadd.xlane.f32.xlu1 %v2974_v8  ;;  %v3635_v8 = vld [vmem:[%s4831_s6] ss:$0 sm:$0xff] (!%p3633_p5) }
0x1281   : > { %v2973_v9 = vpop.xlane.xlu0 %2972 }
0x1282   : > { %v2977_v10 = vmul.f32 0.03125, %v2973_v9 }
0x1283   : > { %v2976_v12 = vpop.xlane.xlu1 %2975 }
0x1284   : > { %v2987_v13 = vadd.f32 1e-06, %v2977_v10  ;;  %v2978_v14 = vmul.f32 0.03125, %v2976_v12 }
0x1286   : > { %4013 = vrsqrt.f32 %v2987_v13  ;;  %v2988_v15 = vadd.f32 1e-06, %v2978_v14 }
0x1288   : > { %4015 = vrsqrt.f32 %v2988_v15 }
0x1290   : > { %v4014_v16 = vpop.eup %4013 }
0x1291   : > { %v2991_v20 = vmul.f32 %v4014_v16, %v2985_v36 }
0x1292   : > { %v4016_v2 = vpop.eup %4015 }
0x1293   : > { %v2992_v22 = vmul.f32 %v4016_v2, %v2986_v19  ;;  %v2999_v23 = vadd.f32 %v3622_v21, %v2991_v20 }
0x1295   : > { %v3000_v17 = vadd.f32 %v3622_v21, %v2992_v22 }
0x1297   : > { %v3001_v24 = vpack.c.bf16 %v3000_v17, %v2999_v23 }
0x1299   : > { %3873 = vmatmul.mubr.msk.bf16.vlgmr.msra.gmra.mrb[48].mxu0 %vm1438_vm1, %v3001_v24 }
0x136c   : > { %v3062_v27 = vpop.f32.mrb[48].mxu0 }
0x136d   : > { %v3063_v7 = vadd.f32 %v3623_v3, %v3062_v27  ;;  %v3874_v28 = vpop.f32.mrb[49].mxu0 }
0x136e   : > { %v3065_v29 = vpop.f32.mrb[50].mxu0 }
0x136f   : > { %v3066_v30 = vadd.f32 %v3623_v3, %v3065_v29  ;;  %v3875_v31 = vpop.f32.mrb[51].mxu0  ;;  %v3069_v32 = vmax.f32 %v3063_v7, 0.0 }
0x1371   : > { %v3070_v33 = vmax.f32 %v3066_v30, 0.0 }
0x1373   : > { %v3071_v34 = vpack.c.bf16 %v3070_v33, %v3069_v32 }
0x1375   : > { %3885 = vmatmul.mubr.msk.bf16.vlgmr.msra.gmra.mrb[48].mxu1 %vm3111_vm13, %v3071_v34 }
0x1448   : > { %v3149_v39 = vpop.f32.mrb[48].mxu1 }
0x1449   : > { %v3150_v40 = vadd.f32 %v3627_v38, %v3149_v39  ;;  %v3886_v18 = vpop.f32.mrb[49].mxu1  ;;  %3163 = sbr.rel (%p3633_p5) target bundleno = 5513 (0x1589), region = 156 }
0x144a   : > { %v3152_v41 = vpop.f32.mrb[50].mxu1 }
0x144b   : > { %v3156_v42 = vadd.f32 %v3150_v40, %v2999_v23  ;;  %v3153_v43 = vadd.f32 %v3627_v38, %v3152_v41  ;;  %v3887_v44 = vpop.f32.mrb[51].mxu1 }
0x144d   : > { %3158 = vst.msk [vmem:[#allocation2] sm:$0xff] %vm1438_vm1, %v3156_v42  ;;  %v3157_v45 = vadd.f32 %v3153_v43, %v3000_v17  ;;  %v3166_v46 = vsel (!%p3633_p5), %vm1438_vm1, %v3156_v42, 0.0 }
0x144e   : > { %3167 = vadd.xlane.f32.xlu0 (!%p3633_p5), %v3166_v46 }
0x144f   : > { %3159 = vst.msk [vmem:[#allocation2 + $0x8] sm:$0xff] %vm1438_vm1, %v3157_v45  ;;  %v3169_v47 = vsel (!%p3633_p5), %vm1438_vm1, %v3157_v45, 0.0 }
0x1452   : > { %3170 = vadd.xlane.f32.xlu0 %v3169_v47 }
0x14db   : > { %v3168_v48 = vpop.xlane.xlu0 %3167 }
0x14dc   : > { %v3172_v49 = vmul.f32 0.03125, %v3168_v48 }
0x14de   : > { %v3174_v51 = vsub.f32 %v3156_v42, %v3172_v49 }
0x14df   : > { %v3171_v52 = vpop.xlane.xlu0 %3170 }
0x14e0   : > { %v3173_v54 = vmul.f32 0.03125, %v3171_v52  ;;  %v3176_v55 = vmul.f32 %v3174_v51, %v3174_v51  ;;  %v3192_v37 = vmul.f32 %v3634_v0, %v3174_v51 }
0x14e2   : > { %v3175_v57 = vsub.f32 %v3157_v45, %v3173_v54  ;;  %v3178_v53 = vsel %vm1438_vm1, %v3176_v55, 0.0 }
0x14e3   : > { %3179 = vadd.xlane.f32.xlu1 %v3178_v53 }
0x14e4   : > { %v3177_v50 = vmul.f32 %v3175_v57, %v3175_v57  ;;  %v3193_v5 = vmul.f32 %v3634_v0, %v3175_v57 }
0x14e6   : > { %v3181_v58 = vsel %vm1438_vm1, %v3177_v50, 0.0 }
0x14e7   : > { %3182 = vadd.xlane.f32.xlu1 %v3181_v58 }
0x1570   : > { %v3180_v59 = vpop.xlane.xlu1 %3179 }
0x1571   : > { %v3184_v61 = vmul.f32 0.03125, %v3180_v59 }
0x1573   : > { %v3194_v62 = vadd.f32 1e-06, %v3184_v61 }
0x1574   : > { %v3183_v60 = vpop.xlane.xlu1 %3182 }
0x1575   : > { %4017 = vrsqrt.f32 %v3194_v62  ;;  %v3185_v56 = vmul.f32 0.03125, %v3183_v60 }
0x1577   : > { %v3195_v63 = vadd.f32 1e-06, %v3185_v56 }
0x1579   : > { %4019 = vrsqrt.f32 %v3195_v63 }
0x157f   : > { %v4018_v1 = vpop.eup %4017 }
0x1580   : > { %v3198_v4 = vmul.f32 %v4018_v1, %v3192_v37 }
0x1582   : > { %v3206_v6 = vadd.f32 %v3635_v8, %v3198_v4 }
0x1583   : > { %v4020_v35 = vpop.eup %4019 }
0x1584   : > { %3208 = vst.msk [vmem:[#allocation3] sm:$0xff] %vm1438_vm1, %v3206_v6  ;;  %v3199_v9 = vmul.f32 %v4020_v35, %v3193_v5 }
0x1586   : > { %v3207_v10 = vadd.f32 %v3635_v8, %v3199_v9 }
0x1588   : > { %3209 = vst.msk [vmem:[#allocation3 + $0x8] sm:$0xff] %vm1438_vm1, %v3207_v10 }
0x1589 PF: > { %s4832_s12 = sld [smem:[#allocation38_spill]]  ;;  %s4096_s20 = smov [#allocation3]  }
0x158a   : > { %s3216_s27 = sshll.u32 %s4096_s20, 4  ;;  %s3217_s27 = int_to_ptr.vmem [resolvable:$true] %s3216_s27 }
0x158b   : > { %s4021_s0 = scalar_lea.vmem %s3217_s27, 256  ;;  %p4028_p10 = scmp.lt.s32.totalorder %s3217_s27, %s3217_s27 }
0x158c   : > { %p4022_p7 = scmp.ne.s32.totalorder %s3217_s27, %s4021_s0  ;;  %p4029_p11 = scmp.lt.s32.totalorder %s4021_s0, %s4021_s0 }
0x158e   : > { %p4030_p12 = por %p4029_p11, %p4028_p10 }
0x158f   : > { %p3892_p6 = scmp.eq.s32.totalorder %s4832_s12, 1 }
0x1591   : > { %p4023_p8 = pnand %p4022_p7, %p3892_p6 }
0x1593   : > { %p4024_p9 = pneg %p4023_p8 }
0x1595   : > { %p4031_p13 = pnand %p4030_p12, %p4024_p9 }
0x1597   : > { %4034 = shalt.err (!%p4031_p13)
}
0x1598   : > { %s4833_s23 = sld [smem:[#allocation36_spill]] }
0x159e   : > { %s4035_s26 = scalar_lea.hbm %s4833_s23, 256 }
0x159f   : > { %p4036_p0 = scmp.ne.s32.totalorder %s4833_s23, %s4035_s26  ;;  %p4041_p3 = scmp.lt.u32.totalorder %s4035_s26, %s4833_s23 }
0x15a1   : > { %p4037_p1 = pnand %p4036_p0, %p3892_p6 }
0x15a3   : > { %p4038_p2 = pneg %p4037_p1 }
0x15a5   : > { %p4043_p4 = pnand %p4041_p3, %p4038_p2 }
0x15a7   : > { %4046 = shalt.err (!%p4043_p4)
}
0x15a8   : > { %s4097_s9 = smov 128  }
0x15a9   : > { %3889 = dma.vmem_to_hbm [thread:$0]  (%p3892_p6), %s3217_s27, 256, %s4833_s23, [#allocation4], %s4097_s9, %s4097_s9, %s4095_s21  }
0x15aa   : > { %4052 = dma.done.wait (%p3892_p6), [#allocation4], 256  }
0x15ab   : > { %4054 = vsyncadd (%p3892_p6), [#allocation4], 4294967040 }
0x15ac PF: > { %s4834_s13 = sld [smem:[#allocation37_spill]] }
0x15b2   : > { %s76_s28 = sadd.s32 1, %s4834_s13  }
0x15b3   : > { %p73_p5 = scmp.ge.s32.totalorder %s76_s28, 4  }
0x15b5   :  { %75 = sbr.rel (!%p73_p5) target bundleno = 75 (0x4b), region = 290 }
0x15bc   :  { %3232 = vsyncpa [#allocation4], 1 }
0x15bd   :  { %3234 = vsyncpa [#allocation4 + $0x1], 1 }

</bundles_post_ra>
